<compile_context>
chip_gen: v7x
topology: tpu7x:2x2x1
jax: 0.10.0
libtpu: 0.0.40
codegen_flags: <defaults>
</compile_context>

<pallas_src>
import math
import jax
import jax.numpy as jnp
from jax.experimental import pallas as pl
from jax.experimental.pallas import tpu as pltpu

TILE_B = 256          # batch rows per grid step (tiny footprint, fits all gens)
FEAT_IN = 392         # 2 * 14 * 14
FEAT_PAD = 512        # padded to a multiple of 128 lanes
H1, H2, H3 = 256, 128, 64
NUM_CLASSES = 2
OUT_PAD = 128         # lane-dense output width


def densenet_kernel(x_ref,
                    w1_ref, b1_ref,
                    w2_ref, b2_ref,
                    w3_ref, b3_ref,
                    w4_ref, b4_ref,
                    o_ref):
    x = x_ref[...]                                                  # (TILE_B, 512) bf16

    # FC1 + ReLU   (BN1 + Dropout1 folded / identity)
    h = jnp.dot(x, w1_ref[...], preferred_element_type=jnp.float32) + b1_ref[...]
    h = jnp.maximum(h, 0.0)

    # FC2 + ReLU   (BN1 folded into w2/b2; BN2 + Dropout2 folded / identity)
    h = jnp.dot(h.astype(w2_ref.dtype), w2_ref[...],
                preferred_element_type=jnp.float32) + b2_ref[...]
    h = jnp.maximum(h, 0.0)

    # FC3 + ReLU   (BN2 folded into w3/b3)
    h = jnp.dot(h.astype(w3_ref.dtype), w3_ref[...],
                preferred_element_type=jnp.float32) + b3_ref[...]
    h = jnp.maximum(h, 0.0)

    # FC4 + softmax over 128 padded class lanes (padded lanes have bias -1e30,
    # so exp() underflows to 0 and they drop out of the denominator).
    logits = jnp.dot(h.astype(w4_ref.dtype), w4_ref[...],
                     preferred_element_type=jnp.float32) + b4_ref[...]
    m = jnp.max(logits, axis=-1, keepdims=True)
    e = jnp.exp(logits - m)
    denom = jnp.sum(e, axis=-1, keepdims=True)
    o_ref[...] = e * pl.reciprocal(denom, approx=True)


def xavier_uniform(key, fan_in, fan_out):
    # torch.nn.init.xavier_uniform_ on (fan_out, fan_in); stored transposed so
    # the kernel computes x @ W.
    a = math.sqrt(6.0 / (fan_in + fan_out))
    return jax.random.uniform(key, (fan_in, fan_out), jnp.float32, -a, a)


def linear_bias(key, fan_in, fan_out):
    # PyTorch nn.Linear default bias init: U(-1/sqrt(fan_in), 1/sqrt(fan_in))
    bound = 1.0 / math.sqrt(fan_in)
    return jax.random.uniform(key, (1, fan_out), jnp.float32, -bound, bound)


def bn_fold(num_features, eps=1e-5):
    # Freshly-initialized BatchNorm1d in eval mode:
    # gamma=1, beta=0, running_mean=0, running_var=1.
    gamma = jnp.ones((1, num_features), jnp.float32)
    beta = jnp.zeros((1, num_features), jnp.float32)
    mean = jnp.zeros((1, num_features), jnp.float32)
    var = jnp.ones((1, num_features), jnp.float32)
    scale = gamma / jnp.sqrt(var + eps)
    shift = beta - mean * scale
    return scale, shift


def fold_bn_into_next(scale, shift, w_next, b_next):
    # (h * scale + shift) @ W + b  ==  h @ (diag(scale) @ W) + (shift @ W + b)
    w_folded = w_next * scale.reshape(-1, 1)
    b_folded = b_next + shift @ w_next
    return w_folded, b_folded


def make_params(key):
    ks = jax.random.split(key, 8)
    w1 = xavier_uniform(ks[0], FEAT_IN, H1)
    b1 = linear_bias(ks[1], FEAT_IN, H1)
    w2 = xavier_uniform(ks[2], H1, H2)
    b2 = linear_bias(ks[3], H1, H2)
    w3 = xavier_uniform(ks[4], H2, H3)
    b3 = linear_bias(ks[5], H2, H3)
    w4 = xavier_uniform(ks[6], H3, NUM_CLASSES)
    b4 = linear_bias(ks[7], H3, NUM_CLASSES)

    s1, t1 = bn_fold(H1)
    s2, t2 = bn_fold(H2)
    s3, t3 = bn_fold(H3)

    # Exact BN fold into the downstream linear layers.
    w2, b2 = fold_bn_into_next(s1, t1, w2, b2)
    w3, b3 = fold_bn_into_next(s2, t2, w3, b3)
    w4, b4 = fold_bn_into_next(s3, t3, w4, b4)

    # Pad w1's K dimension 392 -> 512 (matches the zero-padded input features).
    w1p = jnp.zeros((FEAT_PAD, H1), jnp.float32).at[:FEAT_IN, :].set(w1)

    # Lane-dense FC4: pad classes 2 -> 128. Zero weight columns; -1e30 bias
    # lanes so padded classes contribute ~0 to the softmax.
    w4p = jnp.zeros((H3, OUT_PAD), jnp.float32).at[:, :NUM_CLASSES].set(w4)
    b4p = jnp.full((1, OUT_PAD), -1e30, jnp.float32).at[:, :NUM_CLASSES].set(b4)

    return {
        "w1": w1p.astype(jnp.bfloat16), "b1": b1,
        "w2": w2.astype(jnp.bfloat16), "b2": b2,
        "w3": w3.astype(jnp.bfloat16), "b3": b3,
        "w4": w4p.astype(jnp.bfloat16), "b4": b4p,
    }


@jax.jit
def densenet_forward(x_nchw, params):
    B = x_nchw.shape[0]
    x_flat = x_nchw.reshape(B, -1).astype(jnp.float32)          # x.view(-1, 392)

    # Pad batch to a multiple of TILE_B and features 392 -> 512 (zeros are
    # inert in the dot product); feed the MXU bf16.
    Bp = pl.cdiv(B, TILE_B) * TILE_B
    x_pad = jnp.pad(x_flat, ((0, Bp - B), (0, FEAT_PAD - FEAT_IN)))
    x_pad = x_pad.astype(jnp.bfloat16)

    tile_map = lambda i: (i, 0)
    const_map = lambda i: (0, 0)

    in_specs = [
        pl.BlockSpec((TILE_B, FEAT_PAD), tile_map),    # x tile (pipelined)
        pl.BlockSpec((FEAT_PAD, H1), const_map),       # w1 (VMEM-resident)
        pl.BlockSpec((1, H1), const_map),              # b1
        pl.BlockSpec((H1, H2), const_map),             # w2 (BN1 folded)
        pl.BlockSpec((1, H2), const_map),              # b2
        pl.BlockSpec((H2, H3), const_map),             # w3 (BN2 folded)
        pl.BlockSpec((1, H3), const_map),              # b3
        pl.BlockSpec((H3, OUT_PAD), const_map),        # w4 (BN3 folded, padded)
        pl.BlockSpec((1, OUT_PAD), const_map),         # b4 (padded, -1e30 lanes)
    ]

    out = pl.pallas_call(
        densenet_kernel,
        out_shape=jax.ShapeDtypeStruct((Bp, OUT_PAD), jnp.float32),
        grid=(Bp // TILE_B,),
        in_specs=in_specs,
        out_specs=pl.BlockSpec((TILE_B, OUT_PAD), tile_map),
        compiler_params=pltpu.CompilerParams(
            dimension_semantics=("parallel",)),
    )(x_pad,
      params["w1"], params["b1"],
      params["w2"], params["b2"],
      params["w3"], params["b3"],
      params["w4"], params["b4"])

    # Strip batch padding and the 126 padded class lanes.
    return out[:B, :NUM_CLASSES]


if __name__ == "__main__":
    key = jax.random.PRNGKey(0)
    pkey, xkey = jax.random.split(key)
    params = make_params(pkey)

    # Input implied by the module: (B, 2, 14, 14) -> flattened to 392.
    x = jax.random.normal(xkey, (2, 2, 14, 14), jnp.float32)

    out = densenet_forward(x, params)
    out = jax.block_until_ready(out)

    # Sanity: softmax rows sum to 1 (approx reciprocal -> loose tolerance).
    assert out.shape == (2, NUM_CLASSES)
    assert bool(jnp.allclose(jnp.sum(out, axis=1), 1.0, atol=1e-2))
    print("KERNEL_OK")
</pallas_src>

<mosaic_0001>
module attributes {stable_mosaic.version = 11 : i64} {
  func.func @densenet_kernel(%arg0: i32, %arg1: memref<256x512xbf16, #tpu.memory_space<vmem>>, %arg2: memref<512x256xbf16, #tpu.memory_space<vmem>>, %arg3: memref<1x256xf32, #tpu.memory_space<vmem>>, %arg4: memref<256x128xbf16, #tpu.memory_space<vmem>>, %arg5: memref<1x128xf32, #tpu.memory_space<vmem>>, %arg6: memref<128x64xbf16, #tpu.memory_space<vmem>>, %arg7: memref<1x64xf32, #tpu.memory_space<vmem>>, %arg8: memref<64x128xbf16, #tpu.memory_space<vmem>>, %arg9: memref<1x128xf32, #tpu.memory_space<vmem>>, %arg10: memref<256x128xf32, #tpu.memory_space<vmem>>) attributes {dimension_semantics = [#tpu.dimension_semantics<parallel>], iteration_bounds = array<i64: 1>, scalar_prefetch = 0 : i64, scratch_operands = 0 : i64, tpu.core_type = #tpu.core_type<tc>, window_params = [{transform_indices = @transform_0, window_bounds = array<i64: 256, 512>}, {pipeline_mode = #tpu.pipeline_mode<synchronous>, transform_indices = @transform_1, window_bounds = array<i64: 512, 256>}, {pipeline_mode = #tpu.pipeline_mode<synchronous>, transform_indices = @transform_2, window_bounds = array<i64: 1, 256>}, {pipeline_mode = #tpu.pipeline_mode<synchronous>, transform_indices = @transform_3, window_bounds = array<i64: 256, 128>}, {pipeline_mode = #tpu.pipeline_mode<synchronous>, transform_indices = @transform_4, window_bounds = array<i64: 1, 128>}, {pipeline_mode = #tpu.pipeline_mode<synchronous>, transform_indices = @transform_5, window_bounds = array<i64: 128, 64>}, {pipeline_mode = #tpu.pipeline_mode<synchronous>, transform_indices = @transform_6, window_bounds = array<i64: 1, 64>}, {pipeline_mode = #tpu.pipeline_mode<synchronous>, transform_indices = @transform_7, window_bounds = array<i64: 64, 128>}, {pipeline_mode = #tpu.pipeline_mode<synchronous>, transform_indices = @transform_8, window_bounds = array<i64: 1, 128>}, {transform_indices = @transform_9, window_bounds = array<i64: 256, 128>}]} {
    %c0 = arith.constant 0 : index
    %c0_0 = arith.constant 0 : index
    %0 = vector.load %arg1[%c0, %c0_0] : memref<256x512xbf16, #tpu.memory_space<vmem>>, vector<256x512xbf16>
    %c0_1 = arith.constant 0 : index
    %c0_2 = arith.constant 0 : index
    %1 = vector.load %arg2[%c0_1, %c0_2] : memref<512x256xbf16, #tpu.memory_space<vmem>>, vector<512x256xbf16>
    %cst = arith.constant dense<0.000000e+00> : vector<256x256xf32>
    %2 = tpu.matmul %0, %1, %cst {dimension_numbers = #tpu.dot_dimension_numbers<[1], [0], [0], [1], [0, 0, 1, 1], [], []>} : vector<256x512xbf16>, vector<512x256xbf16>, vector<256x256xf32> -> vector<256x256xf32>
    %c0_3 = arith.constant 0 : index
    %c0_4 = arith.constant 0 : index
    %3 = vector.load %arg3[%c0_3, %c0_4] : memref<1x256xf32, #tpu.memory_space<vmem>>, vector<1x256xf32>
    %4 = vector.broadcast %3 : vector<1x256xf32> to vector<256x256xf32>
    %5 = arith.addf %2, %4 : vector<256x256xf32>
    %cst_5 = arith.constant 0.000000e+00 : f32
    %6 = vector.broadcast %cst_5 : f32 to vector<256x256xf32>
    %7 = arith.maximumf %5, %6 : vector<256x256xf32>
    %8 = arith.truncf %7 : vector<256x256xf32> to vector<256x256xbf16>
    %c0_6 = arith.constant 0 : index
    %c0_7 = arith.constant 0 : index
    %9 = vector.load %arg4[%c0_6, %c0_7] : memref<256x128xbf16, #tpu.memory_space<vmem>>, vector<256x128xbf16>
    %cst_8 = arith.constant dense<0.000000e+00> : vector<256x128xf32>
    %10 = tpu.matmul %8, %9, %cst_8 {dimension_numbers = #tpu.dot_dimension_numbers<[1], [0], [0], [1], [0, 0, 1, 1], [], []>} : vector<256x256xbf16>, vector<256x128xbf16>, vector<256x128xf32> -> vector<256x128xf32>
    %c0_9 = arith.constant 0 : index
    %c0_10 = arith.constant 0 : index
    %11 = vector.load %arg5[%c0_9, %c0_10] : memref<1x128xf32, #tpu.memory_space<vmem>>, vector<1x128xf32>
    %12 = vector.broadcast %11 : vector<1x128xf32> to vector<256x128xf32>
    %13 = arith.addf %10, %12 : vector<256x128xf32>
    %cst_11 = arith.constant 0.000000e+00 : f32
    %14 = vector.broadcast %cst_11 : f32 to vector<256x128xf32>
    %15 = arith.maximumf %13, %14 : vector<256x128xf32>
    %16 = arith.truncf %15 : vector<256x128xf32> to vector<256x128xbf16>
    %c0_12 = arith.constant 0 : index
    %c0_13 = arith.constant 0 : index
    %17 = vector.load %arg6[%c0_12, %c0_13] : memref<128x64xbf16, #tpu.memory_space<vmem>>, vector<128x64xbf16>
    %cst_14 = arith.constant dense<0.000000e+00> : vector<256x64xf32>
    %18 = tpu.matmul %16, %17, %cst_14 {dimension_numbers = #tpu.dot_dimension_numbers<[1], [0], [0], [1], [0, 0, 1, 1], [], []>} : vector<256x128xbf16>, vector<128x64xbf16>, vector<256x64xf32> -> vector<256x64xf32>
    %c0_15 = arith.constant 0 : index
    %c0_16 = arith.constant 0 : index
    %19 = vector.load %arg7[%c0_15, %c0_16] : memref<1x64xf32, #tpu.memory_space<vmem>>, vector<1x64xf32>
    %20 = vector.broadcast %19 : vector<1x64xf32> to vector<256x64xf32>
    %21 = arith.addf %18, %20 : vector<256x64xf32>
    %cst_17 = arith.constant 0.000000e+00 : f32
    %22 = vector.broadcast %cst_17 : f32 to vector<256x64xf32>
    %23 = arith.maximumf %21, %22 : vector<256x64xf32>
    %24 = arith.truncf %23 : vector<256x64xf32> to vector<256x64xbf16>
    %c0_18 = arith.constant 0 : index
    %c0_19 = arith.constant 0 : index
    %25 = vector.load %arg8[%c0_18, %c0_19] : memref<64x128xbf16, #tpu.memory_space<vmem>>, vector<64x128xbf16>
    %cst_20 = arith.constant dense<0.000000e+00> : vector<256x128xf32>
    %26 = tpu.matmul %24, %25, %cst_20 {dimension_numbers = #tpu.dot_dimension_numbers<[1], [0], [0], [1], [0, 0, 1, 1], [], []>} : vector<256x64xbf16>, vector<64x128xbf16>, vector<256x128xf32> -> vector<256x128xf32>
    %c0_21 = arith.constant 0 : index
    %c0_22 = arith.constant 0 : index
    %27 = vector.load %arg9[%c0_21, %c0_22] : memref<1x128xf32, #tpu.memory_space<vmem>>, vector<1x128xf32>
    %28 = vector.broadcast %27 : vector<1x128xf32> to vector<256x128xf32>
    %29 = arith.addf %26, %28 : vector<256x128xf32>
    %cst_23 = arith.constant dense<0xFF800000> : vector<256xf32>
    %30 = vector.multi_reduction <maximumf>, %29, %cst_23 [1] : vector<256x128xf32> to vector<256xf32>
    %31 = vector.shape_cast %30 : vector<256xf32> to vector<256x1xf32>
    %32 = vector.broadcast %31 : vector<256x1xf32> to vector<256x128xf32>
    %33 = arith.subf %29, %32 : vector<256x128xf32>
    %34 = math.exp %33 : vector<256x128xf32>
    %cst_24 = arith.constant dense<0.000000e+00> : vector<256xf32>
    %35 = vector.multi_reduction <add>, %34, %cst_24 [1] : vector<256x128xf32> to vector<256xf32>
    %36 = vector.shape_cast %35 : vector<256xf32> to vector<256x1xf32>
    %37 = tpu.reciprocal %36 {approx = true} : vector<256x1xf32> -> vector<256x1xf32>
    %38 = vector.broadcast %37 : vector<256x1xf32> to vector<256x128xf32>
    %39 = arith.mulf %34, %38 : vector<256x128xf32>
    %c0_25 = arith.constant 0 : index
    %c0_26 = arith.constant 0 : index
    %40 = vector.load %arg10[%c0_25, %c0_26] : memref<256x128xf32, #tpu.memory_space<vmem>>, vector<256x128xf32>
    tpu.vector_store %arg10[%c0_25, %c0_26], %39 {strides = array<i32>} : memref<256x128xf32, #tpu.memory_space<vmem>>, vector<256x128xf32>,
    return
  }
  func.func @transform_0(%arg0: i32) -> (i32, i32) {
    %c0_i32 = arith.constant 0 : i32
    %c0_i32_0 = arith.constant 0 : i32
    return %arg0, %c0_i32 : i32, i32
  }
  func.func @transform_1(%arg0: i32) -> (i32, i32) {
    %c0_i32 = arith.constant 0 : i32
    %c0_i32_0 = arith.constant 0 : i32
    %c0_i32_1 = arith.constant 0 : i32
    return %c0_i32, %c0_i32_0 : i32, i32
  }
  func.func @transform_2(%arg0: i32) -> (i32, i32) {
    %c0_i32 = arith.constant 0 : i32
    %c0_i32_0 = arith.constant 0 : i32
    %c0_i32_1 = arith.constant 0 : i32
    return %c0_i32, %c0_i32_0 : i32, i32
  }
  func.func @transform_3(%arg0: i32) -> (i32, i32) {
    %c0_i32 = arith.constant 0 : i32
    %c0_i32_0 = arith.constant 0 : i32
    %c0_i32_1 = arith.constant 0 : i32
    return %c0_i32, %c0_i32_0 : i32, i32
  }
  func.func @transform_4(%arg0: i32) -> (i32, i32) {
    %c0_i32 = arith.constant 0 : i32
    %c0_i32_0 = arith.constant 0 : i32
    %c0_i32_1 = arith.constant 0 : i32
    return %c0_i32, %c0_i32_0 : i32, i32
  }
  func.func @transform_5(%arg0: i32) -> (i32, i32) {
    %c0_i32 = arith.constant 0 : i32
    %c0_i32_0 = arith.constant 0 : i32
    %c0_i32_1 = arith.constant 0 : i32
    return %c0_i32, %c0_i32_0 : i32, i32
  }
  func.func @transform_6(%arg0: i32) -> (i32, i32) {
    %c0_i32 = arith.constant 0 : i32
    %c0_i32_0 = arith.constant 0 : i32
    %c0_i32_1 = arith.constant 0 : i32
    return %c0_i32, %c0_i32_0 : i32, i32
  }
  func.func @transform_7(%arg0: i32) -> (i32, i32) {
    %c0_i32 = arith.constant 0 : i32
    %c0_i32_0 = arith.constant 0 : i32
    %c0_i32_1 = arith.constant 0 : i32
    return %c0_i32, %c0_i32_0 : i32, i32
  }
  func.func @transform_8(%arg0: i32) -> (i32, i32) {
    %c0_i32 = arith.constant 0 : i32
    %c0_i32_0 = arith.constant 0 : i32
    %c0_i32_1 = arith.constant 0 : i32
    return %c0_i32, %c0_i32_0 : i32, i32
  }
  func.func @transform_9(%arg0: i32) -> (i32, i32) {
    %c0_i32 = arith.constant 0 : i32
    %c0_i32_0 = arith.constant 0 : i32
    return %arg0, %c0_i32 : i32, i32
  }
}

</mosaic_0001>

<bundles_post_ra>
// kernel: densenet_forward.1
= control target key start
LH: loop header
LB: loop body
LE: loop exit
PB: predicated region body
PF: predicated region fallthrough
CT: control target
= control target key end

     0   :  { %vm1958_vm0 = vcmask 523264   ;;  %s4455_s1 = inlined_call_operand.vmem [shape: bf16[512,256], index: 1, kind: input, shape index: {}]   ;;  %s4456_s0 = inlined_call_operand.vmem [shape: bf16[256,512], index: 0, kind: input, shape index: {}]   ;;  %s4457_s3 = inlined_call_operand.vmem [shape: bf16[256,128], index: 3, kind: input, shape index: {}]   ;;  %s4458_s2 = inlined_call_operand.vmem [shape: f32[1,256], index: 2, kind: input, shape index: {}]   ;;  %s4459_s5 = inlined_call_operand.vmem [shape: bf16[128,64], index: 5, kind: input, shape index: {}]   ;;  %s4460_s4 = inlined_call_operand.vmem [shape: f32[1,128], index: 4, kind: input, shape index: {}]   ;;  %s4461_s7 = inlined_call_operand.vmem [shape: bf16[64,128], index: 7, kind: input, shape index: {}]   ;;  %s4462_s6 = inlined_call_operand.vmem [shape: f32[1,64], index: 6, kind: input, shape index: {}]   ;;  %s4463_s8 = inlined_call_operand.vmem [shape: f32[1,128], index: 8, kind: input, shape index: {}]   ;;  %s4464_s9 = inlined_call_operand.vmem [shape: f32[256,128], index: 9, kind: output, shape index: {}]  }
   0x1   :  { %v3039_v0 = vld [vmem:[%s4455_s1 + $0x4] ss:$8 sps:$4 sm:$0xff]   ;;  %v3041_v1 = vld [vmem:[%s4455_s1] ss:$8 sps:$4 sm:$0xff]   ;;  %v3042_v2 = vld [vmem:[%s4455_s1 + $0x14] ss:$8 sps:$4 sm:$0xff]  }
   0x2   :  { %813 = vmatprep.subr.bf16.mxu0 %v3039_v0  ;;  %v3044_v3 = vld [vmem:[%s4455_s1 + $0x10] ss:$8 sps:$4 sm:$0xff]   ;;  %v3045_v4 = vld [vmem:[%s4455_s1 + $0x24] ss:$8 sps:$4 sm:$0xff]   ;;  %v3047_v5 = vld [vmem:[%s4455_s1 + $0x20] ss:$8 sps:$4 sm:$0xff]  }
   0x3   :  { %814 = vmatpush1.bf16.msra.mxu0 %v3041_v1  ;;  %v3048_v6 = vld [vmem:[%s4455_s1 + $0x34] ss:$8 sps:$4 sm:$0xff]   ;;  %v3050_v7 = vld [vmem:[%s4455_s1 + $0x30] ss:$8 sps:$4 sm:$0xff]   ;;  %v3051_v8 = vld [vmem:[%s4455_s1 + $0x44] ss:$8 sps:$4 sm:$0xff]  }
   0x4   :  { %815 = vmatprep.subr.bf16.mxu0 %v3042_v2  ;;  %v3053_v9 = vld [vmem:[%s4455_s1 + $0x40] ss:$8 sps:$4 sm:$0xff]   ;;  %v3054_v10 = vld [vmem:[%s4455_s1 + $0x54] ss:$8 sps:$4 sm:$0xff]   ;;  %v3056_v11 = vld [vmem:[%s4455_s1 + $0x50] ss:$8 sps:$4 sm:$0xff]  }
   0x5   :  { %v3057_v12 = vld [vmem:[%s4455_s1 + $0x64] ss:$8 sps:$4 sm:$0xff]   ;;  %v3059_v14 = vld [vmem:[%s4455_s1 + $0x60] ss:$8 sps:$4 sm:$0xff]   ;;  %v3060_v15 = vld [vmem:[%s4455_s1 + $0x74] ss:$8 sps:$4 sm:$0xff]  }
   0x6   :  { %v3089_v13 = vld [vmem:[%s4456_s0 + $0x4] ss:$16 sps:$4 sm:$0xff]   ;;  %v3062_v16 = vld [vmem:[%s4455_s1 + $0x70] ss:$8 sps:$4 sm:$0xff]   ;;  %v3065_v18 = vld [vmem:[%s4455_s1 + $0x80] ss:$8 sps:$4 sm:$0xff]  }
   0x7   :  { %816 = vmatpush1.bf16.msra.mxu0 %v3044_v3  ;;  %845 = vmatprep.mubr.bf16.mxu0 %v3089_v13  ;;  %v3063_v17 = vld [vmem:[%s4455_s1 + $0x84] ss:$8 sps:$4 sm:$0xff]   ;;  %v3066_v19 = vld [vmem:[%s4455_s1 + $0x94] ss:$8 sps:$4 sm:$0xff]   ;;  %v3068_v20 = vld [vmem:[%s4455_s1 + $0x90] ss:$8 sps:$4 sm:$0xff]  }
   0x8   :  { %817 = vmatprep.subr.bf16.mxu0 %v3045_v4  ;;  %v3069_v21 = vld [vmem:[%s4455_s1 + $0xa4] ss:$8 sps:$4 sm:$0xff]   ;;  %v3071_v22 = vld [vmem:[%s4455_s1 + $0xa0] ss:$8 sps:$4 sm:$0xff]   ;;  %v3072_v23 = vld [vmem:[%s4455_s1 + $0xb4] ss:$8 sps:$4 sm:$0xff]  }
   0x9   :  { %v3074_v24 = vld [vmem:[%s4455_s1 + $0xb0] ss:$8 sps:$4 sm:$0xff]   ;;  %v3075_v25 = vld [vmem:[%s4455_s1 + $0xc4] ss:$8 sps:$4 sm:$0xff]   ;;  %v3077_v26 = vld [vmem:[%s4455_s1 + $0xc0] ss:$8 sps:$4 sm:$0xff]  }
   0xa   :  { %v3078_v27 = vld [vmem:[%s4455_s1 + $0xd4] ss:$8 sps:$4 sm:$0xff]   ;;  %v3080_v28 = vld [vmem:[%s4455_s1 + $0xd0] ss:$8 sps:$4 sm:$0xff]   ;;  %v3081_v29 = vld [vmem:[%s4455_s1 + $0xe4] ss:$8 sps:$4 sm:$0xff]  }
   0xb   :  { %818 = vmatpush1.bf16.msra.mxu0 %v3047_v5  ;;  %v3083_v30 = vld [vmem:[%s4455_s1 + $0xe0] ss:$8 sps:$4 sm:$0xff]   ;;  %v3084_v31 = vld [vmem:[%s4455_s1 + $0xf4] ss:$8 sps:$4 sm:$0xff]   ;;  %v3086_v32 = vld [vmem:[%s4455_s1 + $0xf0] ss:$8 sps:$4 sm:$0xff]  }
   0xc   :  { %819 = vmatprep.subr.bf16.mxu0 %v3048_v6  ;;  %v3092_v33 = vld [vmem:[%s4455_s1 + $0x104] ss:$8 sps:$4 sm:$0xff]   ;;  %v3087_v34 = vld [vmem:[%s4456_s0] ss:$16 sps:$4 sm:$0xff]   ;;  %v3098_v37 = vld [vmem:[%s4455_s1 + $0x114] ss:$8 sps:$4 sm:$0xff]  }
   0xd   :  { %v3090_v35 = vld [vmem:[%s4455_s1 + $0x100] ss:$8 sps:$4 sm:$0xff]   ;;  %v3093_v36 = vld [vmem:[%s4456_s0 + $0x24] ss:$16 sps:$4 sm:$0xff]   ;;  %v3096_v38 = vld [vmem:[%s4455_s1 + $0x110] ss:$8 sps:$4 sm:$0xff]  }
   0xe   :  { %v3104_v39 = vld [vmem:[%s4455_s1 + $0x124] ss:$8 sps:$4 sm:$0xff]   ;;  %v3095_v40 = vld [vmem:[%s4456_s0 + $0x20] ss:$16 sps:$4 sm:$0xff]   ;;  %v3110_v43 = vld [vmem:[%s4455_s1 + $0x134] ss:$8 sps:$4 sm:$0xff]  }
   0xf   :  { %820 = vmatpush1.bf16.msra.mxu0 %v3050_v7  ;;  %v3099_v41 = vld [vmem:[%s4456_s0 + $0x44] ss:$16 sps:$4 sm:$0xff]   ;;  %v3102_v42 = vld [vmem:[%s4455_s1 + $0x120] ss:$8 sps:$4 sm:$0xff]   ;;  %v3108_v44 = vld [vmem:[%s4455_s1 + $0x130] ss:$8 sps:$4 sm:$0xff]  }
  0x10   :  { %821 = vmatprep.subr.bf16.mxu0 %v3051_v8  ;;  %v3116_v45 = vld [vmem:[%s4455_s1 + $0x144] ss:$8 sps:$4 sm:$0xff]   ;;  %v3101_v46 = vld [vmem:[%s4456_s0 + $0x40] ss:$16 sps:$4 sm:$0xff]   ;;  %v3122_v49 = vld [vmem:[%s4455_s1 + $0x154] ss:$8 sps:$4 sm:$0xff]  }
  0x11   :  { %v3105_v47 = vld [vmem:[%s4456_s0 + $0x64] ss:$16 sps:$4 sm:$0xff]   ;;  %v3114_v48 = vld [vmem:[%s4455_s1 + $0x140] ss:$8 sps:$4 sm:$0xff]   ;;  %v3120_v50 = vld [vmem:[%s4455_s1 + $0x150] ss:$8 sps:$4 sm:$0xff]  }
  0x12   :  { %v3128_v51 = vld [vmem:[%s4455_s1 + $0x164] ss:$8 sps:$4 sm:$0xff]   ;;  %v3107_v52 = vld [vmem:[%s4456_s0 + $0x60] ss:$16 sps:$4 sm:$0xff]   ;;  %v3134_v55 = vld [vmem:[%s4455_s1 + $0x174] ss:$8 sps:$4 sm:$0xff]  }
  0x13   :  { %822 = vmatpush1.bf16.msra.mxu0 %v3053_v9  ;;  %v3111_v53 = vld [vmem:[%s4456_s0 + $0x84] ss:$16 sps:$4 sm:$0xff]   ;;  %v3126_v54 = vld [vmem:[%s4455_s1 + $0x160] ss:$8 sps:$4 sm:$0xff]   ;;  %v3132_v56 = vld [vmem:[%s4455_s1 + $0x170] ss:$8 sps:$4 sm:$0xff]  }
  0x14   :  { %823 = vmatprep.subr.bf16.mxu0 %v3054_v10  ;;  %v3140_v57 = vld [vmem:[%s4455_s1 + $0x184] ss:$8 sps:$4 sm:$0xff]   ;;  %v3113_v58 = vld [vmem:[%s4456_s0 + $0x80] ss:$16 sps:$4 sm:$0xff]   ;;  %v3146_v61 = vld [vmem:[%s4455_s1 + $0x194] ss:$8 sps:$4 sm:$0xff]  }
  0x15   :  { %v3117_v59 = vld [vmem:[%s4456_s0 + $0xa4] ss:$16 sps:$4 sm:$0xff]   ;;  %v3138_v60 = vld [vmem:[%s4455_s1 + $0x180] ss:$8 sps:$4 sm:$0xff]   ;;  %v3144_v62 = vld [vmem:[%s4455_s1 + $0x190] ss:$8 sps:$4 sm:$0xff]  }
  0x16   :  { %v3152_v63 = vld [vmem:[%s4455_s1 + $0x1a4] ss:$8 sps:$4 sm:$0xff]   ;;  %v3119_v0 = vld [vmem:[%s4456_s0 + $0xa0] ss:$16 sps:$4 sm:$0xff]   ;;  %v3158_v3 = vld [vmem:[%s4455_s1 + $0x1b4] ss:$8 sps:$4 sm:$0xff]  }
  0x17   :  { %824 = vmatpush1.bf16.msra.mxu0 %v3056_v11  ;;  %v3123_v1 = vld [vmem:[%s4456_s0 + $0xc4] ss:$16 sps:$4 sm:$0xff]   ;;  %v3150_v2 = vld [vmem:[%s4455_s1 + $0x1a0] ss:$8 sps:$4 sm:$0xff]   ;;  %v3156_v4 = vld [vmem:[%s4455_s1 + $0x1b0] ss:$8 sps:$4 sm:$0xff]  }
  0x18   :  { %825 = vmatprep.subr.bf16.mxu0 %v3057_v12  ;;  %v3164_v5 = vld [vmem:[%s4455_s1 + $0x1c4] ss:$8 sps:$4 sm:$0xff]   ;;  %v3125_v6 = vld [vmem:[%s4456_s0 + $0xc0] ss:$16 sps:$4 sm:$0xff]   ;;  %v3170_v9 = vld [vmem:[%s4455_s1 + $0x1d4] ss:$8 sps:$4 sm:$0xff]  }
  0x19   :  { %v3129_v7 = vld [vmem:[%s4456_s0 + $0xe4] ss:$16 sps:$4 sm:$0xff]   ;;  %v3162_v8 = vld [vmem:[%s4455_s1 + $0x1c0] ss:$8 sps:$4 sm:$0xff]   ;;  %v3168_v10 = vld [vmem:[%s4455_s1 + $0x1d0] ss:$8 sps:$4 sm:$0xff]  }
  0x1a   :  { %v3176_v11 = vld [vmem:[%s4455_s1 + $0x1e4] ss:$8 sps:$4 sm:$0xff]   ;;  %v3131_v12 = vld [vmem:[%s4456_s0 + $0xe0] ss:$16 sps:$4 sm:$0xff]  }
  0x1b   :  { %826 = vmatpush1.bf16.msra.mxu0 %v3059_v14  ;;  %v3135_v13 = vld [vmem:[%s4456_s0 + $0x104] ss:$16 sps:$4 sm:$0xff]   ;;  %v3174_v14 = vld [vmem:[%s4455_s1 + $0x1e0] ss:$8 sps:$4 sm:$0xff]  }
  0x1c   :  { %827 = vmatprep.subr.bf16.mxu0 %v3060_v15  ;;  %v3182_v15 = vld [vmem:[%s4455_s1 + $0x1f4] ss:$8 sps:$4 sm:$0xff]  }
  0x1f   :  { %828 = vmatpush1.bf16.msra.mxu0 %v3062_v16  ;;  %v3180_v16 = vld [vmem:[%s4455_s1 + $0x1f0] ss:$8 sps:$4 sm:$0xff]  }
  0x20   :  { %829 = vmatprep.subr.bf16.mxu0 %v3063_v17  ;;  %v3137_v17 = vld [vmem:[%s4456_s0 + $0x100] ss:$16 sps:$4 sm:$0xff]  }
  0x23   :  { %830 = vmatpush1.bf16.msra.mxu0 %v3065_v18  ;;  %v3141_v18 = vld [vmem:[%s4456_s0 + $0x124] ss:$16 sps:$4 sm:$0xff]  }
  0x24   :  { %831 = vmatprep.subr.bf16.mxu0 %v3066_v19  ;;  %v3143_v19 = vld [vmem:[%s4456_s0 + $0x120] ss:$16 sps:$4 sm:$0xff]  }
  0x27   :  { %832 = vmatpush1.bf16.msra.mxu0 %v3068_v20  ;;  %v3147_v20 = vld [vmem:[%s4456_s0 + $0x144] ss:$16 sps:$4 sm:$0xff]  }
  0x28   :  { %833 = vmatprep.subr.bf16.mxu0 %v3069_v21  ;;  %v3149_v21 = vld [vmem:[%s4456_s0 + $0x140] ss:$16 sps:$4 sm:$0xff]  }
  0x2b   :  { %834 = vmatpush1.bf16.msra.mxu0 %v3071_v22  ;;  %v3153_v22 = vld [vmem:[%s4456_s0 + $0x164] ss:$16 sps:$4 sm:$0xff]  }
  0x2c   :  { %835 = vmatprep.subr.bf16.mxu0 %v3072_v23  ;;  %v3155_v23 = vld [vmem:[%s4456_s0 + $0x160] ss:$16 sps:$4 sm:$0xff]  }
  0x2f   :  { %836 = vmatpush1.bf16.msra.mxu0 %v3074_v24  ;;  %v3159_v24 = vld [vmem:[%s4456_s0 + $0x184] ss:$16 sps:$4 sm:$0xff]  }
  0x30   :  { %837 = vmatprep.subr.bf16.mxu0 %v3075_v25  ;;  %v3161_v25 = vld [vmem:[%s4456_s0 + $0x180] ss:$16 sps:$4 sm:$0xff]  }
  0x33   :  { %838 = vmatpush1.bf16.msra.mxu0 %v3077_v26  ;;  %v3165_v26 = vld [vmem:[%s4456_s0 + $0x1a4] ss:$16 sps:$4 sm:$0xff]  }
  0x34   :  { %839 = vmatprep.subr.bf16.mxu0 %v3078_v27  ;;  %v3167_v27 = vld [vmem:[%s4456_s0 + $0x1a0] ss:$16 sps:$4 sm:$0xff]  }
  0x37   :  { %840 = vmatpush1.bf16.msra.mxu0 %v3080_v28  ;;  %v3171_v28 = vld [vmem:[%s4456_s0 + $0x1c4] ss:$16 sps:$4 sm:$0xff]  }
  0x38   :  { %841 = vmatprep.subr.bf16.mxu0 %v3081_v29  ;;  %v3173_v29 = vld [vmem:[%s4456_s0 + $0x1c0] ss:$16 sps:$4 sm:$0xff]  }
  0x3b   :  { %842 = vmatpush1.bf16.msra.mxu0 %v3083_v30  ;;  %v3177_v30 = vld [vmem:[%s4456_s0 + $0x1e4] ss:$16 sps:$4 sm:$0xff]  }
  0x3c   :  { %843 = vmatprep.subr.bf16.mxu0 %v3084_v31  ;;  %v3179_v31 = vld [vmem:[%s4456_s0 + $0x1e0] ss:$16 sps:$4 sm:$0xff]  }
  0x3f   :  { %844 = vmatpush1.bf16.msra.mxu0 %v3086_v32  ;;  %v3185_v32 = vld [vmem:[%s4456_s0 + $0xc] ss:$16 sps:$4 sm:$0xff]  }
  0x40   :  { %1006 = vmatprep.subr.bf16.mxu0 %v3092_v33  ;;  %v3231_v33 = vld [vmem:[%s4457_s3 + $0x40] sm:$0xff]  }
  0x41   :  { %2667 = vmatprep.subr.bf16.mxu1 %v3231_v33 }
  0x42   :  { %846 = vmatmul.mubr.bf16.vlgmr.msra.gmra.mrb[0].mxu0 %v3087_v34  ;;  %v3183_v34 = vld [vmem:[%s4456_s0 + $0x8] ss:$16 sps:$4 sm:$0xff]  }
  0x43   :  { %1007 = vmatpush1.bf16.msra.mxu0 %v3090_v35  ;;  %855 = vmatprep.mubr.bf16.mxu0 %v3093_v36  ;;  %v3232_v35 = vld [vmem:[%s4457_s3] sm:$0xff]   ;;  %v3186_v36 = vld [vmem:[%s4456_s0 + $0x2c] ss:$16 sps:$4 sm:$0xff]  }
  0x44   :  { %1008 = vmatprep.subr.bf16.mxu0 %v3098_v37  ;;  %v3233_v37 = vld [vmem:[%s4457_s3 + $0x48] sm:$0xff]   ;;  %2668 = vmatpush3.bf16.msra.mxu1 %v3232_v35 }
  0x45   :  { %2669 = vmatprep.subr.bf16.mxu1 %v3233_v37 }
  0x47   :  { %1009 = vmatpush1.bf16.msra.mxu0 %v3096_v38  ;;  %v3234_v38 = vld [vmem:[%s4457_s3 + $0x8] sm:$0xff]  }
  0x48   :  { %1010 = vmatprep.subr.bf16.mxu0 %v3104_v39  ;;  %v3235_v39 = vld [vmem:[%s4457_s3 + $0x50] sm:$0xff]   ;;  %2670 = vmatpush3.bf16.msra.mxu1 %v3234_v38 }
  0x49   :  { %2671 = vmatprep.subr.bf16.mxu1 %v3235_v39 }
  0x4a   :  { %856 = vmatmul.mubr.bf16.gmra.mrb[4].mxu0 %v3095_v40  ;;  %v3236_v40 = vld [vmem:[%s4457_s3 + $0x10] sm:$0xff]  }
  0x4b   :  { %865 = vmatprep.mubr.bf16.mxu0 %v3099_v41  ;;  %1011 = vmatpush1.bf16.msra.mxu0 %v3102_v42  ;;  %v3237_v41 = vld [vmem:[%s4457_s3 + $0x58] sm:$0xff]  }
  0x4c   :  { %1012 = vmatprep.subr.bf16.mxu0 %v3110_v43  ;;  %v3188_v42 = vld [vmem:[%s4456_s0 + $0x28] ss:$16 sps:$4 sm:$0xff]   ;;  %v3189_v43 = vld [vmem:[%s4456_s0 + $0x4c] ss:$16 sps:$4 sm:$0xff]   ;;  %2672 = vmatpush3.bf16.msra.mxu1 %v3236_v40 }
  0x4d   :  { %2673 = vmatprep.subr.bf16.mxu1 %v3237_v41  ;;  %v3248_v41 = vld [vmem:[%s4459_s5 + $0x8] sm:$0xff]  }
  0x4f   :  { %1013 = vmatpush1.bf16.msra.mxu0 %v3108_v44  ;;  %v3238_v44 = vld [vmem:[%s4457_s3 + $0x18] sm:$0xff]  }
  0x50   :  { %1014 = vmatprep.subr.bf16.mxu0 %v3116_v45  ;;  %v3239_v45 = vld [vmem:[%s4457_s3 + $0x60] sm:$0xff]   ;;  %2674 = vmatpush3.bf16.msra.mxu1 %v3238_v44 }
  0x51   :  { %2675 = vmatprep.subr.bf16.mxu1 %v3239_v45 }
  0x52   :  { %866 = vmatmul.mubr.bf16.gmra.mrb[8].mxu0 %v3101_v46  ;;  %v3240_v46 = vld [vmem:[%s4457_s3 + $0x20] sm:$0xff]  }
  0x53   :  { %875 = vmatprep.mubr.bf16.mxu0 %v3105_v47  ;;  %1015 = vmatpush1.bf16.msra.mxu0 %v3114_v48  ;;  %v3241_v47 = vld [vmem:[%s4457_s3 + $0x68] sm:$0xff]  }
  0x54   :  { %1016 = vmatprep.subr.bf16.mxu0 %v3122_v49  ;;  %v3191_v48 = vld [vmem:[%s4456_s0 + $0x48] ss:$16 sps:$4 sm:$0xff]   ;;  %2676 = vmatpush3.bf16.msra.mxu1 %v3240_v46  ;;  %v3192_v49 = vld [vmem:[%s4456_s0 + $0x6c] ss:$16 sps:$4 sm:$0xff]  }
  0x55   :  { %2677 = vmatprep.subr.bf16.mxu1 %v3241_v47 }
  0x57   :  { %1017 = vmatpush1.bf16.msra.mxu0 %v3120_v50  ;;  %v3194_v50 = vld [vmem:[%s4456_s0 + $0x68] ss:$16 sps:$4 sm:$0xff]  }
  0x58   :  { %1018 = vmatprep.subr.bf16.mxu0 %v3128_v51  ;;  %v3195_v51 = vld [vmem:[%s4456_s0 + $0x8c] ss:$16 sps:$4 sm:$0xff]  }
  0x5a   :  { %876 = vmatmul.mubr.bf16.gmra.mrb[12].mxu0 %v3107_v52  ;;  %v3197_v52 = vld [vmem:[%s4456_s0 + $0x88] ss:$16 sps:$4 sm:$0xff]  }
  0x5b   :  { %885 = vmatprep.mubr.bf16.mxu0 %v3111_v53  ;;  %1019 = vmatpush1.bf16.msra.mxu0 %v3126_v54  ;;  %v3198_v53 = vld [vmem:[%s4456_s0 + $0xac] ss:$16 sps:$4 sm:$0xff]   ;;  %v3200_v54 = vld [vmem:[%s4456_s0 + $0xa8] ss:$16 sps:$4 sm:$0xff]  }
  0x5c   :  { %1020 = vmatprep.subr.bf16.mxu0 %v3134_v55  ;;  %v3201_v55 = vld [vmem:[%s4456_s0 + $0xcc] ss:$16 sps:$4 sm:$0xff]  }
  0x5f   :  { %1021 = vmatpush1.bf16.msra.mxu0 %v3132_v56  ;;  %v3203_v56 = vld [vmem:[%s4456_s0 + $0xc8] ss:$16 sps:$4 sm:$0xff]  }
  0x60   :  { %1022 = vmatprep.subr.bf16.mxu0 %v3140_v57  ;;  %v3204_v57 = vld [vmem:[%s4456_s0 + $0xec] ss:$16 sps:$4 sm:$0xff]  }
  0x62   :  { %886 = vmatmul.mubr.bf16.gmra.mrb[16].mxu0 %v3113_v58  ;;  %v3206_v58 = vld [vmem:[%s4456_s0 + $0xe8] ss:$16 sps:$4 sm:$0xff]  }
  0x63   :  { %895 = vmatprep.mubr.bf16.mxu0 %v3117_v59  ;;  %1023 = vmatpush1.bf16.msra.mxu0 %v3138_v60  ;;  %v3207_v59 = vld [vmem:[%s4456_s0 + $0x10c] ss:$16 sps:$4 sm:$0xff]   ;;  %v3209_v60 = vld [vmem:[%s4456_s0 + $0x108] ss:$16 sps:$4 sm:$0xff]  }
  0x64   :  { %1024 = vmatprep.subr.bf16.mxu0 %v3146_v61  ;;  %v3210_v61 = vld [vmem:[%s4456_s0 + $0x12c] ss:$16 sps:$4 sm:$0xff]  }
  0x67   :  { %1025 = vmatpush1.bf16.msra.mxu0 %v3144_v62  ;;  %v3212_v62 = vld [vmem:[%s4456_s0 + $0x128] ss:$16 sps:$4 sm:$0xff]  }
  0x68   :  { %1026 = vmatprep.subr.bf16.mxu0 %v3152_v63  ;;  %v3213_v63 = vld [vmem:[%s4456_s0 + $0x14c] ss:$16 sps:$4 sm:$0xff]  }
  0x6a   :  { %896 = vmatmul.mubr.bf16.gmra.mrb[20].mxu0 %v3119_v0  ;;  %v3215_v0 = vld [vmem:[%s4456_s0 + $0x148] ss:$16 sps:$4 sm:$0xff]  }
  0x6b   :  { %905 = vmatprep.mubr.bf16.mxu0 %v3123_v1  ;;  %1027 = vmatpush1.bf16.msra.mxu0 %v3150_v2  ;;  %v3216_v1 = vld [vmem:[%s4456_s0 + $0x16c] ss:$16 sps:$4 sm:$0xff]  }
  0x6c   :  { %1028 = vmatprep.subr.bf16.mxu0 %v3158_v3  ;;  %v3242_v2 = vld [vmem:[%s4457_s3 + $0x28] sm:$0xff]  }
  0x6d   :  { %2678 = vmatpush3.bf16.msra.mxu1 %v3242_v2  ;;  %v3218_v3 = vld [vmem:[%s4456_s0 + $0x168] ss:$16 sps:$4 sm:$0xff]  }
  0x6f   :  { %1029 = vmatpush1.bf16.msra.mxu0 %v3156_v4  ;;  %v3243_v4 = vld [vmem:[%s4457_s3 + $0x70] sm:$0xff]  }
  0x70   :  { %1030 = vmatprep.subr.bf16.mxu0 %v3164_v5  ;;  %v3219_v5 = vld [vmem:[%s4456_s0 + $0x18c] ss:$16 sps:$4 sm:$0xff]   ;;  %2679 = vmatprep.subr.bf16.mxu1 %v3243_v4 }
  0x72   :  { %906 = vmatmul.mubr.bf16.gmra.mrb[24].mxu0 %v3125_v6  ;;  %v3244_v6 = vld [vmem:[%s4457_s3 + $0x30] sm:$0xff]  }
  0x73   :  { %915 = vmatprep.mubr.bf16.mxu0 %v3129_v7  ;;  %1031 = vmatpush1.bf16.msra.mxu0 %v3162_v8  ;;  %v3245_v7 = vld [vmem:[%s4457_s3 + $0x78] sm:$0xff]  }
  0x74   :  { %1032 = vmatprep.subr.bf16.mxu0 %v3170_v9  ;;  %2680 = vmatpush3.bf16.msra.mxu1 %v3244_v6  ;;  %v3246_v8 = vld [vmem:[%s4457_s3 + $0x38] sm:$0xff]  }
  0x75   :  { %2681 = vmatprep.subr.bf16.mxu1 %v3245_v7  ;;  %v3221_v9 = vld [vmem:[%s4456_s0 + $0x188] ss:$16 sps:$4 sm:$0xff]  }
  0x77   :  { %1033 = vmatpush1.bf16.msra.mxu0 %v3168_v10  ;;  %v3222_v10 = vld [vmem:[%s4456_s0 + $0x1ac] ss:$16 sps:$4 sm:$0xff]  }
  0x78   :  { %1034 = vmatprep.subr.bf16.mxu0 %v3176_v11  ;;  %2682 = vmatpush3.bf16.msra.mxu1 %v3246_v8  ;;  %v3224_v11 = vld [vmem:[%s4456_s0 + $0x1a8] ss:$16 sps:$4 sm:$0xff]  }
  0x7a   :  { %916 = vmatmul.mubr.bf16.gmra.mrb[28].mxu0 %v3131_v12  ;;  %v3225_v12 = vld [vmem:[%s4456_s0 + $0x1cc] ss:$16 sps:$4 sm:$0xff]  }
  0x7b   :  { %925 = vmatprep.mubr.bf16.mxu0 %v3135_v13  ;;  %1035 = vmatpush1.bf16.msra.mxu0 %v3174_v14  ;;  %v3227_v13 = vld [vmem:[%s4456_s0 + $0x1c8] ss:$16 sps:$4 sm:$0xff]   ;;  %v3228_v14 = vld [vmem:[%s4456_s0 + $0x1ec] ss:$16 sps:$4 sm:$0xff]  }
  0x7c   :  { %1036 = vmatprep.subr.bf16.mxu0 %v3182_v15  ;;  %v3230_v15 = vld [vmem:[%s4456_s0 + $0x1e8] ss:$16 sps:$4 sm:$0xff]  }
  0x7f   :  { %1037 = vmatpush1.bf16.msra.mxu0 %v3180_v16  ;;  %v163_v16 = vlaneseq }
  0x82   :  { %926 = vmatmul.mubr.bf16.gmra.mrb[32].mxu0 %v3137_v17  ;;  %v164_v17 = vshrl.u32 %v163_v16, 7 }
  0x83   :  { %935 = vmatprep.mubr.bf16.mxu0 %v3141_v18 }
  0x84   :  { %v165_v18 = vsub.s32 0, %v164_v17 }
  0x8a   :  { %936 = vmatmul.mubr.bf16.gmra.mrb[36].mxu0 %v3143_v19  ;;  %v161_v19 = vld [vmem:[%s4458_s2] sm:$0x3] }
  0x8b   :  { %945 = vmatprep.mubr.bf16.mxu0 %v3147_v20  ;;  %v169_v20 = vsub.s32 1, %v164_v17 }
  0x92   :  { %946 = vmatmul.mubr.bf16.gmra.mrb[40].mxu0 %v3149_v21  ;;  %v3872_v21 = vrot.slane %v161_v19, %v165_v18 }
  0x93   :  { %955 = vmatprep.mubr.bf16.mxu0 %v3153_v22  ;;  %v3874_v22 = vrot.slane %v161_v19, %v169_v20 }
  0x9a   :  { %956 = vmatmul.mubr.bf16.gmra.mrb[44].mxu0 %v3155_v23 }
  0x9b   :  { %965 = vmatprep.mubr.bf16.mxu0 %v3159_v24 }
  0xa2   :  { %966 = vmatmul.mubr.bf16.gmra.mrb[48].mxu0 %v3161_v25 }
  0xa3   :  { %975 = vmatprep.mubr.bf16.mxu0 %v3165_v26 }
  0xaa   :  { %976 = vmatmul.mubr.bf16.gmra.mrb[52].mxu0 %v3167_v27 }
  0xab   :  { %985 = vmatprep.mubr.bf16.mxu0 %v3171_v28 }
  0xb2   :  { %986 = vmatmul.mubr.bf16.gmra.mrb[56].mxu0 %v3173_v29 }
  0xb3   :  { %995 = vmatprep.mubr.bf16.mxu0 %v3177_v30 }
  0xba   :  { %996 = vmatmul.mubr.bf16.gmra.mrb[60].mxu0 %v3179_v31  ;;  %v3247_v31 = vld [vmem:[%s4459_s5] sm:$0xff]  }
  0xbb   :  { %1038 = vmatprep.mubr.bf16.mxu0 %v3185_v32  ;;  %2823 = vmatprep.subr.bf16.mxu1 %v3247_v31 }
  0xc2   :  { %1039 = vmatmul.mubr.bf16.vlgmr.msra.gmra.mrb[0].mxu0 %v3183_v34 }
  0xc3   :  { %1048 = vmatprep.mubr.bf16.mxu0 %v3186_v36 }
  0xca   :  { %1049 = vmatmul.mubr.bf16.gmra.mrb[4].mxu0 %v3188_v42 }
  0xcb   :  { %1058 = vmatprep.mubr.bf16.mxu0 %v3189_v43 }
  0xd2   :  { %1059 = vmatmul.mubr.bf16.gmra.mrb[8].mxu0 %v3191_v48 }
  0xd3   :  { %1068 = vmatprep.mubr.bf16.mxu0 %v3192_v49  ;;  %v3249_v49 = vld [vmem:[%s4459_s5 + $0x10] sm:$0xff]  }
  0xda   :  { %1069 = vmatmul.mubr.bf16.gmra.mrb[12].mxu0 %v3194_v50 }
  0xdb   :  { %1078 = vmatprep.mubr.bf16.mxu0 %v3195_v51 }
  0xe2   :  { %1079 = vmatmul.mubr.bf16.gmra.mrb[16].mxu0 %v3197_v52 }
  0xe3   :  { %1088 = vmatprep.mubr.bf16.mxu0 %v3198_v53 }
  0xea   :  { %1089 = vmatmul.mubr.bf16.gmra.mrb[20].mxu0 %v3200_v54 }
  0xeb   :  { %1098 = vmatprep.mubr.bf16.mxu0 %v3201_v55 }
  0xf2   :  { %1099 = vmatmul.mubr.bf16.gmra.mrb[24].mxu0 %v3203_v56 }
  0xf3   :  { %1108 = vmatprep.mubr.bf16.mxu0 %v3204_v57  ;;  %v3250_v57 = vld [vmem:[%s4459_s5 + $0x18] sm:$0xff]  }
  0xfa   :  { %1109 = vmatmul.mubr.bf16.gmra.mrb[28].mxu0 %v3206_v58 }
  0xfb   :  { %1118 = vmatprep.mubr.bf16.mxu0 %v3207_v59 }
 0x102   :  { %1119 = vmatmul.mubr.bf16.gmra.mrb[32].mxu0 %v3209_v60 }
 0x103   :  { %1128 = vmatprep.mubr.bf16.mxu0 %v3210_v61 }
 0x10a   :  { %1129 = vmatmul.mubr.bf16.gmra.mrb[36].mxu0 %v3212_v62 }
 0x10b   :  { %1138 = vmatprep.mubr.bf16.mxu0 %v3213_v63 }
 0x112   :  { %1139 = vmatmul.mubr.bf16.gmra.mrb[40].mxu0 %v3215_v0 }
 0x113   :  { %1148 = vmatprep.mubr.bf16.mxu0 %v3216_v1 }
 0x11a   :  { %1149 = vmatmul.mubr.bf16.gmra.mrb[44].mxu0 %v3218_v3 }
 0x11b   :  { %1158 = vmatprep.mubr.bf16.mxu0 %v3219_v5 }
 0x122   :  { %1159 = vmatmul.mubr.bf16.gmra.mrb[48].mxu0 %v3221_v9 }
 0x123   :  { %1168 = vmatprep.mubr.bf16.mxu0 %v3222_v10 }
 0x12a   :  { %1169 = vmatmul.mubr.bf16.gmra.mrb[52].mxu0 %v3224_v11 }
 0x12b   :  { %1178 = vmatprep.mubr.bf16.mxu0 %v3225_v12 }
 0x132   :  { %1179 = vmatmul.mubr.bf16.gmra.mrb[56].mxu0 %v3227_v13 }
 0x133   :  { %1188 = vmatprep.mubr.bf16.mxu0 %v3228_v14 }
 0x13a   :  { %1189 = vmatmul.mubr.bf16.gmra.mrb[60].mxu0 %v3230_v15 }
 0x195   :  { %v1040_v23 = vpop.f32.mrb[0].mxu0 }
 0x196   :  { %v2911_v24 = vadd.f32 %v1040_v23, %v3872_v21  ;;  %v1042_v25 = vpop.f32.mrb[1].mxu0 }
 0x197   :  { %v2912_v26 = vadd.f32 %v1042_v25, %v3874_v22  ;;  %v1044_v27 = vpop.f32.mrb[2].mxu0 }
 0x198   :  { %v2913_v28 = vadd.f32 %v1044_v27, %v3872_v21  ;;  %v1046_v29 = vpop.f32.mrb[3].mxu0  ;;  %v1199_v32 = vmax.f32 %v2911_v24, 0.0 }
 0x199   :  { %v2914_v30 = vadd.f32 %v1046_v29, %v3874_v22  ;;  %v1200_v34 = vmax.f32 %v2912_v26, 0.0 }
 0x19a   :  { %v1201_v33 = vmax.f32 %v2913_v28, 0.0 }
 0x19b   :  { %v1202_v35 = vmax.f32 %v2914_v30, 0.0 }
 0x19c   :  { %v1263_v36 = vpack.c.bf16 %v1201_v33, %v1199_v32 }
 0x19d   :  { %v1050_v37 = vpop.f32.mrb[4].mxu0  ;;  %v1264_v38 = vpack.c.bf16 %v1202_v35, %v1200_v34 }
 0x19e   :  { %v2915_v39 = vadd.f32 %v1050_v37, %v3872_v21  ;;  %v1052_v40 = vpop.f32.mrb[5].mxu0 }
 0x19f   :  { %v2916_v42 = vadd.f32 %v1052_v40, %v3874_v22  ;;  %v1054_v43 = vpop.f32.mrb[6].mxu0  ;;  %1462 = vmatprep.mubr.bf16.mxu1 %v1264_v38 }
 0x1a0   :  { %v2917_v44 = vadd.f32 %v1054_v43, %v3872_v21  ;;  %v1056_v45 = vpop.f32.mrb[7].mxu0  ;;  %1463 = vmatmul.mubr.bf16.vlgmr.msra.gmra.mrb[0].mxu1 %v1263_v36  ;;  %v1203_v47 = vmax.f32 %v2915_v39, 0.0 }
 0x1a1   :  { %v2918_v46 = vadd.f32 %v1056_v45, %v3874_v22  ;;  %2824 = vmatpush3.bf16.msra.mxu1 %v3247_v31  ;;  %v1204_v50 = vmax.f32 %v2916_v42, 0.0 }
 0x1a2   :  { %v1205_v48 = vmax.f32 %v2917_v44, 0.0  ;;  %2825 = vmatprep.subr.bf16.mxu1 %v3248_v41 }
 0x1a3   :  { %v1206_v51 = vmax.f32 %v2918_v46, 0.0 }
 0x1a4   :  { %v1265_v52 = vpack.c.bf16 %v1205_v48, %v1203_v47 }
 0x1a5   :  { %v1266_v53 = vpack.c.bf16 %v1206_v51, %v1204_v50  ;;  %v1060_v54 = vpop.f32.mrb[8].mxu0  ;;  %2826 = vmatpush3.bf16.msra.mxu1 %v3248_v41 }
 0x1a6   :  { %v2919_v55 = vadd.f32 %v1060_v54, %v3872_v21  ;;  %v1062_v56 = vpop.f32.mrb[9].mxu0  ;;  %2827 = vmatprep.subr.bf16.mxu1 %v3249_v49 }
 0x1a7   :  { %v2920_v58 = vadd.f32 %v1062_v56, %v3874_v22  ;;  %v1064_v59 = vpop.f32.mrb[10].mxu0  ;;  %1470 = vmatprep.mubr.bf16.mxu1 %v1266_v53 }
 0x1a8   :  { %v2921_v60 = vadd.f32 %v1064_v59, %v3872_v21  ;;  %v1066_v61 = vpop.f32.mrb[11].mxu0  ;;  %1471 = vmatmul.mubr.bf16.gmra.mrb[4].mxu1 %v1265_v52  ;;  %v1207_v63 = vmax.f32 %v2919_v55, 0.0 }
 0x1a9   :  { %v2922_v62 = vadd.f32 %v1066_v61, %v3874_v22  ;;  %2828 = vmatpush3.bf16.msra.mxu1 %v3249_v49  ;;  %v1208_v1 = vmax.f32 %v2920_v58, 0.0 }
 0x1aa   :  { %v1209_v0 = vmax.f32 %v2921_v60, 0.0  ;;  %2829 = vmatprep.subr.bf16.mxu1 %v3250_v57 }
 0x1ab   :  { %v1210_v2 = vmax.f32 %v2922_v62, 0.0 }
 0x1ac   :  { %v1267_v3 = vpack.c.bf16 %v1209_v0, %v1207_v63 }
 0x1ad   :  { %v1268_v4 = vpack.c.bf16 %v1210_v2, %v1208_v1  ;;  %v1070_v5 = vpop.f32.mrb[12].mxu0  ;;  %2830 = vmatpush3.bf16.msra.mxu1 %v3250_v57 }
 0x1ae   :  { %v2923_v6 = vadd.f32 %v1070_v5, %v3872_v21  ;;  %v1072_v7 = vpop.f32.mrb[13].mxu0 }
 0x1af   :  { %v2924_v8 = vadd.f32 %v1072_v7, %v3874_v22  ;;  %v1074_v9 = vpop.f32.mrb[14].mxu0  ;;  %1478 = vmatprep.mubr.bf16.mxu1 %v1268_v4 }
 0x1b0   :  { %v2925_v10 = vadd.f32 %v1074_v9, %v3872_v21  ;;  %v1076_v11 = vpop.f32.mrb[15].mxu0  ;;  %1479 = vmatmul.mubr.bf16.gmra.mrb[8].mxu1 %v1267_v3  ;;  %v1211_v13 = vmax.f32 %v2923_v6, 0.0 }
 0x1b1   :  { %v2926_v12 = vadd.f32 %v1076_v11, %v3874_v22  ;;  %v1212_v15 = vmax.f32 %v2924_v8, 0.0 }
 0x1b2   :  { %v1213_v14 = vmax.f32 %v2925_v10, 0.0 }
 0x1b3   :  { %v1214_v16 = vmax.f32 %v2926_v12, 0.0 }
 0x1b4   :  { %v1269_v17 = vpack.c.bf16 %v1213_v14, %v1211_v13 }
 0x1b5   :  { %v1270_v18 = vpack.c.bf16 %v1214_v16, %v1212_v15  ;;  %v1080_v19 = vpop.f32.mrb[16].mxu0 }
 0x1b6   :  { %v2927_v20 = vadd.f32 %v1080_v19, %v3872_v21  ;;  %v1082_v23 = vpop.f32.mrb[17].mxu0 }
 0x1b7   :  { %v2928_v24 = vadd.f32 %v1082_v23, %v3874_v22  ;;  %v1084_v25 = vpop.f32.mrb[18].mxu0  ;;  %1486 = vmatprep.mubr.bf16.mxu1 %v1270_v18 }
 0x1b8   :  { %v2929_v26 = vadd.f32 %v1084_v25, %v3872_v21  ;;  %v1086_v27 = vpop.f32.mrb[19].mxu0  ;;  %1487 = vmatmul.mubr.bf16.gmra.mrb[12].mxu1 %v1269_v17  ;;  %v1215_v29 = vmax.f32 %v2927_v20, 0.0 }
 0x1b9   :  { %v2930_v28 = vadd.f32 %v1086_v27, %v3874_v22  ;;  %v1216_v31 = vmax.f32 %v2928_v24, 0.0 }
 0x1ba   :  { %v1217_v30 = vmax.f32 %v2929_v26, 0.0 }
 0x1bb   :  { %v1218_v32 = vmax.f32 %v2930_v28, 0.0 }
 0x1bc   :  { %v1271_v33 = vpack.c.bf16 %v1217_v30, %v1215_v29 }
 0x1bd   :  { %v1272_v34 = vpack.c.bf16 %v1218_v32, %v1216_v31  ;;  %v1090_v35 = vpop.f32.mrb[20].mxu0 }
 0x1be   :  { %v2931_v36 = vadd.f32 %v1090_v35, %v3872_v21  ;;  %v1092_v37 = vpop.f32.mrb[21].mxu0 }
 0x1bf   :  { %v2932_v38 = vadd.f32 %v1092_v37, %v3874_v22  ;;  %v1094_v39 = vpop.f32.mrb[22].mxu0  ;;  %1494 = vmatprep.mubr.bf16.mxu1 %v1272_v34 }
 0x1c0   :  { %v2933_v40 = vadd.f32 %v1094_v39, %v3872_v21  ;;  %v1096_v41 = vpop.f32.mrb[23].mxu0  ;;  %1495 = vmatmul.mubr.bf16.gmra.mrb[16].mxu1 %v1271_v33  ;;  %v1219_v43 = vmax.f32 %v2931_v36, 0.0 }
 0x1c1   :  { %v2934_v42 = vadd.f32 %v1096_v41, %v3874_v22  ;;  %v1220_v45 = vmax.f32 %v2932_v38, 0.0 }
 0x1c2   :  { %v1221_v44 = vmax.f32 %v2933_v40, 0.0 }
 0x1c3   :  { %v1222_v46 = vmax.f32 %v2934_v42, 0.0 }
 0x1c4   :  { %v1273_v47 = vpack.c.bf16 %v1221_v44, %v1219_v43 }
 0x1c5   :  { %v1274_v48 = vpack.c.bf16 %v1222_v46, %v1220_v45  ;;  %v1100_v49 = vpop.f32.mrb[24].mxu0 }
 0x1c6   :  { %v2935_v50 = vadd.f32 %v1100_v49, %v3872_v21  ;;  %v1102_v51 = vpop.f32.mrb[25].mxu0 }
 0x1c7   :  { %v2936_v52 = vadd.f32 %v1102_v51, %v3874_v22  ;;  %v1104_v53 = vpop.f32.mrb[26].mxu0  ;;  %1502 = vmatprep.mubr.bf16.mxu1 %v1274_v48 }
 0x1c8   :  { %v2937_v54 = vadd.f32 %v1104_v53, %v3872_v21  ;;  %v1106_v55 = vpop.f32.mrb[27].mxu0  ;;  %1503 = vmatmul.mubr.bf16.gmra.mrb[20].mxu1 %v1273_v47  ;;  %v1223_v57 = vmax.f32 %v2935_v50, 0.0 }
 0x1c9   :  { %v2938_v56 = vadd.f32 %v1106_v55, %v3874_v22  ;;  %v1224_v59 = vmax.f32 %v2936_v52, 0.0 }
 0x1ca   :  { %v1225_v58 = vmax.f32 %v2937_v54, 0.0 }
 0x1cb   :  { %v1226_v60 = vmax.f32 %v2938_v56, 0.0 }
 0x1cc   :  { %v1275_v61 = vpack.c.bf16 %v1225_v58, %v1223_v57 }
 0x1cd   :  { %v1276_v62 = vpack.c.bf16 %v1226_v60, %v1224_v59  ;;  %v1110_v63 = vpop.f32.mrb[28].mxu0 }
 0x1ce   :  { %v2939_v0 = vadd.f32 %v1110_v63, %v3872_v21  ;;  %v1112_v1 = vpop.f32.mrb[29].mxu0 }
 0x1cf   :  { %v2940_v2 = vadd.f32 %v1112_v1, %v3874_v22  ;;  %v1114_v3 = vpop.f32.mrb[30].mxu0  ;;  %1510 = vmatprep.mubr.bf16.mxu1 %v1276_v62 }
 0x1d0   :  { %v2941_v4 = vadd.f32 %v1114_v3, %v3872_v21  ;;  %v1116_v5 = vpop.f32.mrb[31].mxu0  ;;  %1511 = vmatmul.mubr.bf16.gmra.mrb[24].mxu1 %v1275_v61  ;;  %v1227_v7 = vmax.f32 %v2939_v0, 0.0 }
 0x1d1   :  { %v2942_v6 = vadd.f32 %v1116_v5, %v3874_v22  ;;  %v1228_v9 = vmax.f32 %v2940_v2, 0.0 }
 0x1d2   :  { %v1229_v8 = vmax.f32 %v2941_v4, 0.0 }
 0x1d3   :  { %v1230_v10 = vmax.f32 %v2942_v6, 0.0 }
 0x1d4   :  { %v1277_v11 = vpack.c.bf16 %v1229_v8, %v1227_v7  ;;  %v3251_v8 = vld [vmem:[%s4459_s5 + $0x20] sm:$0xff]  }
 0x1d5   :  { %v1278_v12 = vpack.c.bf16 %v1230_v10, %v1228_v9  ;;  %v1120_v13 = vpop.f32.mrb[32].mxu0  ;;  %2831 = vmatprep.subr.bf16.mxu1 %v3251_v8 }
 0x1d6   :  { %v2943_v14 = vadd.f32 %v1120_v13, %v3872_v21  ;;  %v1122_v15 = vpop.f32.mrb[33].mxu0  ;;  %2832 = vmatpush3.bf16.msra.mxu1 %v3251_v8 }
 0x1d7   :  { %v2944_v16 = vadd.f32 %v1122_v15, %v3874_v22  ;;  %v1124_v17 = vpop.f32.mrb[34].mxu0  ;;  %1518 = vmatprep.mubr.bf16.mxu1 %v1278_v12 }
 0x1d8   :  { %v2945_v18 = vadd.f32 %v1124_v17, %v3872_v21  ;;  %v1126_v19 = vpop.f32.mrb[35].mxu0  ;;  %1519 = vmatmul.mubr.bf16.gmra.mrb[28].mxu1 %v1277_v11  ;;  %v1231_v23 = vmax.f32 %v2943_v14, 0.0 }
 0x1d9   :  { %v2946_v20 = vadd.f32 %v1126_v19, %v3874_v22  ;;  %v1232_v25 = vmax.f32 %v2944_v16, 0.0  ;;  %v3252_v16 = vld [vmem:[%s4459_s5 + $0x28] sm:$0xff]  }
 0x1da   :  { %v1233_v24 = vmax.f32 %v2945_v18, 0.0  ;;  %2833 = vmatprep.subr.bf16.mxu1 %v3252_v16 }
 0x1db   :  { %v1234_v26 = vmax.f32 %v2946_v20, 0.0  ;;  %2834 = vmatpush3.bf16.msra.mxu1 %v3252_v16 }
 0x1dc   :  { %v1279_v27 = vpack.c.bf16 %v1233_v24, %v1231_v23 }
 0x1dd   :  { %v1280_v28 = vpack.c.bf16 %v1234_v26, %v1232_v25  ;;  %v1130_v29 = vpop.f32.mrb[36].mxu0  ;;  %v3253_v26 = vld [vmem:[%s4459_s5 + $0x30] sm:$0xff]  }
 0x1de   :  { %v2947_v30 = vadd.f32 %v1130_v29, %v3872_v21  ;;  %v1132_v31 = vpop.f32.mrb[37].mxu0  ;;  %2835 = vmatprep.subr.bf16.mxu1 %v3253_v26 }
 0x1df   :  { %v2948_v32 = vadd.f32 %v1132_v31, %v3874_v22  ;;  %v1134_v33 = vpop.f32.mrb[38].mxu0  ;;  %1526 = vmatprep.mubr.bf16.mxu1 %v1280_v28  ;;  %2836 = vmatpush3.bf16.msra.mxu1 %v3253_v26 }
 0x1e0   :  { %v2949_v34 = vadd.f32 %v1134_v33, %v3872_v21  ;;  %v1136_v35 = vpop.f32.mrb[39].mxu0  ;;  %1527 = vmatmul.mubr.bf16.gmra.mrb[32].mxu1 %v1279_v27  ;;  %v1235_v37 = vmax.f32 %v2947_v30, 0.0 }
 0x1e1   :  { %v2950_v36 = vadd.f32 %v1136_v35, %v3874_v22  ;;  %v1236_v39 = vmax.f32 %v2948_v32, 0.0 }
 0x1e2   :  { %v1237_v38 = vmax.f32 %v2949_v34, 0.0  ;;  %v3254_v34 = vld [vmem:[%s4459_s5 + $0x38] sm:$0xff]  }
 0x1e3   :  { %v1238_v40 = vmax.f32 %v2950_v36, 0.0  ;;  %2837 = vmatprep.subr.bf16.mxu1 %v3254_v34 }
 0x1e4   :  { %v1281_v41 = vpack.c.bf16 %v1237_v38, %v1235_v37  ;;  %2838 = vmatpush3.bf16.msra.mxu1 %v3254_v34 }
 0x1e5   :  { %v1282_v42 = vpack.c.bf16 %v1238_v40, %v1236_v39  ;;  %v1140_v43 = vpop.f32.mrb[40].mxu0 }
 0x1e6   :  { %v2951_v44 = vadd.f32 %v1140_v43, %v3872_v21  ;;  %v1142_v45 = vpop.f32.mrb[41].mxu0 }
 0x1e7   :  { %v2952_v46 = vadd.f32 %v1142_v45, %v3874_v22  ;;  %v1144_v47 = vpop.f32.mrb[42].mxu0  ;;  %1534 = vmatprep.mubr.bf16.mxu1 %v1282_v42 }
 0x1e8   :  { %v2953_v48 = vadd.f32 %v1144_v47, %v3872_v21  ;;  %v1146_v49 = vpop.f32.mrb[43].mxu0  ;;  %1535 = vmatmul.mubr.bf16.gmra.mrb[36].mxu1 %v1281_v41  ;;  %v1239_v51 = vmax.f32 %v2951_v44, 0.0 }
 0x1e9   :  { %v2954_v50 = vadd.f32 %v1146_v49, %v3874_v22  ;;  %v1240_v53 = vmax.f32 %v2952_v46, 0.0 }
 0x1ea   :  { %v1241_v52 = vmax.f32 %v2953_v48, 0.0 }
 0x1eb   :  { %v1242_v54 = vmax.f32 %v2954_v50, 0.0 }
 0x1ec   :  { %v1283_v55 = vpack.c.bf16 %v1241_v52, %v1239_v51 }
 0x1ed   :  { %v1284_v56 = vpack.c.bf16 %v1242_v54, %v1240_v53  ;;  %v1150_v57 = vpop.f32.mrb[44].mxu0 }
 0x1ee   :  { %v2955_v58 = vadd.f32 %v1150_v57, %v3872_v21  ;;  %v1152_v59 = vpop.f32.mrb[45].mxu0 }
 0x1ef   :  { %v2956_v60 = vadd.f32 %v1152_v59, %v3874_v22  ;;  %v1154_v61 = vpop.f32.mrb[46].mxu0  ;;  %1542 = vmatprep.mubr.bf16.mxu1 %v1284_v56 }
 0x1f0   :  { %v2957_v62 = vadd.f32 %v1154_v61, %v3872_v21  ;;  %v1156_v63 = vpop.f32.mrb[47].mxu0  ;;  %1543 = vmatmul.mubr.bf16.gmra.mrb[40].mxu1 %v1283_v55  ;;  %v1243_v1 = vmax.f32 %v2955_v58, 0.0 }
 0x1f1   :  { %v2958_v0 = vadd.f32 %v1156_v63, %v3874_v22  ;;  %v1244_v3 = vmax.f32 %v2956_v60, 0.0 }
 0x1f2   :  { %v1245_v2 = vmax.f32 %v2957_v62, 0.0 }
 0x1f3   :  { %v1246_v4 = vmax.f32 %v2958_v0, 0.0 }
 0x1f4   :  { %v1285_v5 = vpack.c.bf16 %v1245_v2, %v1243_v1 }
 0x1f5   :  { %v1286_v6 = vpack.c.bf16 %v1246_v4, %v1244_v3  ;;  %v1160_v7 = vpop.f32.mrb[48].mxu0 }
 0x1f6   :  { %v2959_v9 = vadd.f32 %v1160_v7, %v3872_v21  ;;  %v1162_v10 = vpop.f32.mrb[49].mxu0 }
 0x1f7   :  { %v2960_v11 = vadd.f32 %v1162_v10, %v3874_v22  ;;  %v1164_v12 = vpop.f32.mrb[50].mxu0  ;;  %1550 = vmatprep.mubr.bf16.mxu1 %v1286_v6  ;;  %v3967_v6 = vld [vmem:[%s4460_s4] ss:$0 sm:$0xff] }
 0x1f8   :  { %v2961_v13 = vadd.f32 %v1164_v12, %v3872_v21  ;;  %v1166_v14 = vpop.f32.mrb[51].mxu0  ;;  %1551 = vmatmul.mubr.bf16.gmra.mrb[44].mxu1 %v1285_v5  ;;  %v1247_v17 = vmax.f32 %v2959_v9, 0.0 }
 0x1f9   :  { %v2962_v15 = vadd.f32 %v1166_v14, %v3874_v22  ;;  %v1248_v19 = vmax.f32 %v2960_v11, 0.0  ;;  %v3255_v11 = vld [vmem:[%s4461_s7] sm:$0xff]  }
 0x1fa   :  { %v1249_v18 = vmax.f32 %v2961_v13, 0.0  ;;  %2871 = vmatprep.subr.bf16.mxu1 %v3255_v11 }
 0x1fb   :  { %v1250_v20 = vmax.f32 %v2962_v15, 0.0 }
 0x1fc   :  { %v1287_v23 = vpack.c.bf16 %v1249_v18, %v1247_v17 }
 0x1fd   :  { %v1288_v24 = vpack.c.bf16 %v1250_v20, %v1248_v19  ;;  %v1170_v25 = vpop.f32.mrb[52].mxu0 }
 0x1fe   :  { %v2963_v27 = vadd.f32 %v1170_v25, %v3872_v21  ;;  %v1172_v28 = vpop.f32.mrb[53].mxu0 }
 0x1ff   :  { %v2964_v29 = vadd.f32 %v1172_v28, %v3874_v22  ;;  %v1174_v30 = vpop.f32.mrb[54].mxu0  ;;  %1558 = vmatprep.mubr.bf16.mxu1 %v1288_v24 }
 0x200   :  { %v2965_v31 = vadd.f32 %v1174_v30, %v3872_v21  ;;  %v1176_v32 = vpop.f32.mrb[55].mxu0  ;;  %1559 = vmatmul.mubr.bf16.gmra.mrb[48].mxu1 %v1287_v23  ;;  %v1251_v35 = vmax.f32 %v2963_v27, 0.0 }
 0x201   :  { %v2966_v33 = vadd.f32 %v1176_v32, %v3874_v22  ;;  %v1252_v37 = vmax.f32 %v2964_v29, 0.0 }
 0x202   :  { %v1253_v36 = vmax.f32 %v2965_v31, 0.0 }
 0x203   :  { %v1254_v38 = vmax.f32 %v2966_v33, 0.0  ;;  %v3256_v33 = vld [vmem:[%s4461_s7 + $0x8] sm:$0xff]  }
 0x204   :  { %v1289_v39 = vpack.c.bf16 %v1253_v36, %v1251_v35 }
 0x205   :  { %v1290_v40 = vpack.c.bf16 %v1254_v38, %v1252_v37  ;;  %v1180_v41 = vpop.f32.mrb[56].mxu0 }
 0x206   :  { %v2967_v42 = vadd.f32 %v1180_v41, %v3872_v21  ;;  %v1182_v43 = vpop.f32.mrb[57].mxu0 }
 0x207   :  { %v2968_v44 = vadd.f32 %v1182_v43, %v3874_v22  ;;  %v1184_v45 = vpop.f32.mrb[58].mxu0  ;;  %1566 = vmatprep.mubr.bf16.mxu1 %v1290_v40 }
 0x208   :  { %v2969_v46 = vadd.f32 %v1184_v45, %v3872_v21  ;;  %v1186_v47 = vpop.f32.mrb[59].mxu0  ;;  %1567 = vmatmul.mubr.bf16.gmra.mrb[52].mxu1 %v1289_v39  ;;  %v1255_v49 = vmax.f32 %v2967_v42, 0.0 }
 0x209   :  { %v2970_v48 = vadd.f32 %v1186_v47, %v3874_v22  ;;  %v1256_v51 = vmax.f32 %v2968_v44, 0.0 }
 0x20a   :  { %v1257_v50 = vmax.f32 %v2969_v46, 0.0 }
 0x20b   :  { %v1258_v52 = vmax.f32 %v2970_v48, 0.0 }
 0x20c   :  { %v1291_v53 = vpack.c.bf16 %v1257_v50, %v1255_v49 }
 0x20d   :  { %v1292_v54 = vpack.c.bf16 %v1258_v52, %v1256_v51  ;;  %v1190_v55 = vpop.f32.mrb[60].mxu0 }
 0x20e   :  { %v2971_v56 = vadd.f32 %v1190_v55, %v3872_v21  ;;  %v1192_v57 = vpop.f32.mrb[61].mxu0 }
 0x20f   :  { %v2972_v58 = vadd.f32 %v1192_v57, %v3874_v22  ;;  %v1194_v59 = vpop.f32.mrb[62].mxu0  ;;  %1574 = vmatprep.mubr.bf16.mxu1 %v1292_v54 }
 0x210   :  { %v2973_v60 = vadd.f32 %v1194_v59, %v3872_v21  ;;  %v1196_v61 = vpop.f32.mrb[63].mxu0  ;;  %1575 = vmatmul.mubr.bf16.gmra.mrb[56].mxu1 %v1291_v53  ;;  %v1259_v63 = vmax.f32 %v2971_v56, 0.0 }
 0x211   :  { %v2974_v62 = vadd.f32 %v1196_v61, %v3874_v22  ;;  %v1260_v1 = vmax.f32 %v2972_v58, 0.0 }
 0x212   :  { %v1261_v0 = vmax.f32 %v2973_v60, 0.0 }
 0x213   :  { %v1262_v2 = vmax.f32 %v2974_v62, 0.0 }
 0x214   :  { %v1293_v3 = vpack.c.bf16 %v1261_v0, %v1259_v63 }
 0x215   :  { %v1294_v4 = vpack.c.bf16 %v1262_v2, %v1260_v1 }
 0x217   :  { %1582 = vmatprep.mubr.bf16.mxu1 %v1294_v4 }
 0x218   :  { %1583 = vmatmul.mubr.bf16.gmra.mrb[60].mxu1 %v1293_v3 }
 0x273   :  { %v2683_v5 = vpop.f32.mrb[0].mxu1 }
 0x274   :  { %v2684_v7 = vpop.f32.mrb[1].mxu1 }
 0x275   :  { %v2685_v21 = vadd.f32 %v2684_v7, %v2683_v5  ;;  %v2686_v8 = vpop.f32.mrb[2].mxu1 }
 0x276   :  { %v2687_v9 = vpop.f32.mrb[3].mxu1 }
 0x277   :  { %v1465_v22 = vadd.f32 %v2685_v21, %v3967_v6  ;;  %v2688_v10 = vadd.f32 %v2687_v9, %v2686_v8 }
 0x279   :  { %v1468_v12 = vadd.f32 %v2688_v10, %v3967_v6  ;;  %v1591_v13 = vmax.f32 %v1465_v22, 0.0 }
 0x27b   :  { %v1592_v14 = vmax.f32 %v1468_v12, 0.0  ;;  %v2689_v15 = vpop.f32.mrb[4].mxu1 }
 0x27c   :  { %v2690_v16 = vpop.f32.mrb[5].mxu1 }
 0x27d   :  { %v2691_v17 = vadd.f32 %v2690_v16, %v2689_v15  ;;  %v2692_v18 = vpop.f32.mrb[6].mxu1  ;;  %v1623_v19 = vpack.c.bf16 %v1592_v14, %v1591_v13 }
 0x27e   :  { %v2693_v20 = vpop.f32.mrb[7].mxu1 }
 0x27f   :  { %v1473_v23 = vadd.f32 %v2691_v17, %v3967_v6  ;;  %v2694_v24 = vadd.f32 %v2693_v20, %v2692_v18  ;;  %2839 = vmatprep.mubr.bf16.mxu1 %v1623_v19 }
 0x281   :  { %v1476_v25 = vadd.f32 %v2694_v24, %v3967_v6  ;;  %v1593_v26 = vmax.f32 %v1473_v23, 0.0 }
 0x283   :  { %v1594_v27 = vmax.f32 %v1476_v25, 0.0  ;;  %v2695_v28 = vpop.f32.mrb[8].mxu1 }
 0x284   :  { %v2696_v29 = vpop.f32.mrb[9].mxu1 }
 0x285   :  { %v1624_v30 = vpack.c.bf16 %v1594_v27, %v1593_v26  ;;  %v2697_v31 = vadd.f32 %v2696_v29, %v2695_v28  ;;  %v2698_v32 = vpop.f32.mrb[10].mxu1 }
 0x286   :  { %v2699_v34 = vpop.f32.mrb[11].mxu1 }
 0x287   :  { %v1481_v35 = vadd.f32 %v2697_v31, %v3967_v6  ;;  %v2700_v36 = vadd.f32 %v2699_v34, %v2698_v32  ;;  %2840 = vmatmul.mubr.bf16.vlgmr.msra.gmra.mrb[64].mxu1 %v1624_v30 }
 0x288   :  { %2872 = vmatpush3.bf16.msra.mxu1 %v3255_v11 }
 0x289   :  { %v1484_v37 = vadd.f32 %v2700_v36, %v3967_v6  ;;  %2873 = vmatprep.subr.bf16.mxu1 %v3256_v33  ;;  %v1595_v38 = vmax.f32 %v1481_v35, 0.0 }
 0x28b   :  { %v1596_v39 = vmax.f32 %v1484_v37, 0.0  ;;  %v2701_v40 = vpop.f32.mrb[12].mxu1 }
 0x28c   :  { %v2702_v41 = vpop.f32.mrb[13].mxu1  ;;  %2874 = vmatpush3.bf16.msra.mxu1 %v3256_v33 }
 0x28d   :  { %v2703_v42 = vadd.f32 %v2702_v41, %v2701_v40  ;;  %v2704_v43 = vpop.f32.mrb[14].mxu1  ;;  %v1625_v44 = vpack.c.bf16 %v1596_v39, %v1595_v38 }
 0x28e   :  { %v2705_v45 = vpop.f32.mrb[15].mxu1 }
 0x28f   :  { %v1489_v46 = vadd.f32 %v2703_v42, %v3967_v6  ;;  %v2706_v47 = vadd.f32 %v2705_v45, %v2704_v43  ;;  %2843 = vmatprep.mubr.bf16.mxu1 %v1625_v44 }
 0x291   :  { %v1492_v48 = vadd.f32 %v2706_v47, %v3967_v6  ;;  %v1597_v49 = vmax.f32 %v1489_v46, 0.0 }
 0x293   :  { %v1598_v50 = vmax.f32 %v1492_v48, 0.0  ;;  %v2707_v51 = vpop.f32.mrb[16].mxu1 }
 0x294   :  { %v2708_v52 = vpop.f32.mrb[17].mxu1 }
 0x295   :  { %v2709_v53 = vadd.f32 %v2708_v52, %v2707_v51  ;;  %v2710_v54 = vpop.f32.mrb[18].mxu1  ;;  %v1626_v55 = vpack.c.bf16 %v1598_v50, %v1597_v49 }
 0x296   :  { %v2711_v56 = vpop.f32.mrb[19].mxu1 }
 0x297   :  { %v1497_v57 = vadd.f32 %v2709_v53, %v3967_v6  ;;  %v2712_v58 = vadd.f32 %v2711_v56, %v2710_v54  ;;  %2844 = vmatmul.mubr.bf16.gmra.mrb[68].mxu1 %v1626_v55 }
 0x299   :  { %v1500_v59 = vadd.f32 %v2712_v58, %v3967_v6  ;;  %v1599_v60 = vmax.f32 %v1497_v57, 0.0 }
 0x29b   :  { %v1600_v61 = vmax.f32 %v1500_v59, 0.0  ;;  %v2713_v62 = vpop.f32.mrb[20].mxu1 }
 0x29c   :  { %v2714_v63 = vpop.f32.mrb[21].mxu1 }
 0x29d   :  { %v2715_v0 = vadd.f32 %v2714_v63, %v2713_v62  ;;  %v2716_v1 = vpop.f32.mrb[22].mxu1  ;;  %v1627_v2 = vpack.c.bf16 %v1600_v61, %v1599_v60 }
 0x29e   :  { %v2717_v3 = vpop.f32.mrb[23].mxu1 }
 0x29f   :  { %v1505_v4 = vadd.f32 %v2715_v0, %v3967_v6  ;;  %v2718_v5 = vadd.f32 %v2717_v3, %v2716_v1  ;;  %2847 = vmatprep.mubr.bf16.mxu1 %v1627_v2 }
 0x2a1   :  { %v1508_v7 = vadd.f32 %v2718_v5, %v3967_v6  ;;  %v1601_v21 = vmax.f32 %v1505_v4, 0.0 }
 0x2a3   :  { %v1602_v8 = vmax.f32 %v1508_v7, 0.0  ;;  %v2719_v9 = vpop.f32.mrb[24].mxu1 }
 0x2a4   :  { %v2720_v22 = vpop.f32.mrb[25].mxu1 }
 0x2a5   :  { %v2721_v10 = vadd.f32 %v2720_v22, %v2719_v9  ;;  %v2722_v11 = vpop.f32.mrb[26].mxu1  ;;  %v1628_v12 = vpack.c.bf16 %v1602_v8, %v1601_v21 }
 0x2a6   :  { %v2723_v13 = vpop.f32.mrb[27].mxu1 }
 0x2a7   :  { %v1513_v14 = vadd.f32 %v2721_v10, %v3967_v6  ;;  %v2724_v15 = vadd.f32 %v2723_v13, %v2722_v11  ;;  %2848 = vmatmul.mubr.bf16.gmra.mrb[72].mxu1 %v1628_v12 }
 0x2a9   :  { %v1516_v16 = vadd.f32 %v2724_v15, %v3967_v6  ;;  %v1603_v17 = vmax.f32 %v1513_v14, 0.0 }
 0x2ab   :  { %v1604_v18 = vmax.f32 %v1516_v16, 0.0  ;;  %v2725_v19 = vpop.f32.mrb[28].mxu1 }
 0x2ac   :  { %v2726_v20 = vpop.f32.mrb[29].mxu1 }
 0x2ad   :  { %v2727_v23 = vadd.f32 %v2726_v20, %v2725_v19  ;;  %v2728_v24 = vpop.f32.mrb[30].mxu1  ;;  %v1629_v25 = vpack.c.bf16 %v1604_v18, %v1603_v17 }
 0x2ae   :  { %v2729_v26 = vpop.f32.mrb[31].mxu1 }
 0x2af   :  { %v1521_v27 = vadd.f32 %v2727_v23, %v3967_v6  ;;  %v2730_v28 = vadd.f32 %v2729_v26, %v2728_v24  ;;  %2851 = vmatprep.mubr.bf16.mxu1 %v1629_v25  ;;  %v3257_v25 = vld [vmem:[%s4461_s7 + $0x10] sm:$0xff]  }
 0x2b0   :  { %2875 = vmatprep.subr.bf16.mxu1 %v3257_v25 }
 0x2b1   :  { %v1524_v29 = vadd.f32 %v2730_v28, %v3967_v6  ;;  %v1605_v30 = vmax.f32 %v1521_v27, 0.0  ;;  %2876 = vmatpush3.bf16.msra.mxu1 %v3257_v25 }
 0x2b3   :  { %v1606_v31 = vmax.f32 %v1524_v29, 0.0  ;;  %v2731_v32 = vpop.f32.mrb[32].mxu1 }
 0x2b4   :  { %v2732_v33 = vpop.f32.mrb[33].mxu1 }
 0x2b5   :  { %v2733_v34 = vadd.f32 %v2732_v33, %v2731_v32  ;;  %v2734_v35 = vpop.f32.mrb[34].mxu1  ;;  %v1630_v36 = vpack.c.bf16 %v1606_v31, %v1605_v30  ;;  %v3258_v33 = vld [vmem:[%s4461_s7 + $0x18] sm:$0xff]  }
 0x2b6   :  { %v2735_v37 = vpop.f32.mrb[35].mxu1  ;;  %2877 = vmatprep.subr.bf16.mxu1 %v3258_v33 }
 0x2b7   :  { %v1529_v38 = vadd.f32 %v2733_v34, %v3967_v6  ;;  %v2736_v39 = vadd.f32 %v2735_v37, %v2734_v35  ;;  %2852 = vmatmul.mubr.bf16.gmra.mrb[76].mxu1 %v1630_v36 }
 0x2b8   :  { %2878 = vmatpush3.bf16.msra.mxu1 %v3258_v33 }
 0x2b9   :  { %v1532_v40 = vadd.f32 %v2736_v39, %v3967_v6  ;;  %v1607_v41 = vmax.f32 %v1529_v38, 0.0 }
 0x2bb   :  { %v1608_v42 = vmax.f32 %v1532_v40, 0.0  ;;  %v2737_v43 = vpop.f32.mrb[36].mxu1 }
 0x2bc   :  { %v2738_v44 = vpop.f32.mrb[37].mxu1 }
 0x2bd   :  { %v2739_v45 = vadd.f32 %v2738_v44, %v2737_v43  ;;  %v2740_v46 = vpop.f32.mrb[38].mxu1  ;;  %v1631_v47 = vpack.c.bf16 %v1608_v42, %v1607_v41 }
 0x2be   :  { %v2741_v48 = vpop.f32.mrb[39].mxu1 }
 0x2bf   :  { %v1537_v49 = vadd.f32 %v2739_v45, %v3967_v6  ;;  %v2742_v50 = vadd.f32 %v2741_v48, %v2740_v46  ;;  %2855 = vmatprep.mubr.bf16.mxu1 %v1631_v47 }
 0x2c1   :  { %v1540_v51 = vadd.f32 %v2742_v50, %v3967_v6  ;;  %v1609_v52 = vmax.f32 %v1537_v49, 0.0 }
 0x2c3   :  { %v1610_v53 = vmax.f32 %v1540_v51, 0.0  ;;  %v2743_v54 = vpop.f32.mrb[40].mxu1 }
 0x2c4   :  { %v2744_v55 = vpop.f32.mrb[41].mxu1 }
 0x2c5   :  { %v2745_v56 = vadd.f32 %v2744_v55, %v2743_v54  ;;  %v2746_v57 = vpop.f32.mrb[42].mxu1  ;;  %v1632_v58 = vpack.c.bf16 %v1610_v53, %v1609_v52 }
 0x2c6   :  { %v2747_v59 = vpop.f32.mrb[43].mxu1 }
 0x2c7   :  { %v1545_v60 = vadd.f32 %v2745_v56, %v3967_v6  ;;  %v2748_v61 = vadd.f32 %v2747_v59, %v2746_v57  ;;  %2856 = vmatmul.mubr.bf16.gmra.mrb[80].mxu1 %v1632_v58 }
 0x2c9   :  { %v1548_v62 = vadd.f32 %v2748_v61, %v3967_v6  ;;  %v1611_v63 = vmax.f32 %v1545_v60, 0.0  ;;  %v4016_v60 = vld [vmem:[%s4462_s6] ss:$0 sm:$0xff] }
 0x2cb   :  { %v1612_v0 = vmax.f32 %v1548_v62, 0.0  ;;  %v2749_v1 = vpop.f32.mrb[44].mxu1 }
 0x2cc   :  { %v2750_v2 = vpop.f32.mrb[45].mxu1 }
 0x2cd   :  { %v2751_v3 = vadd.f32 %v2750_v2, %v2749_v1  ;;  %v2752_v4 = vpop.f32.mrb[46].mxu1  ;;  %v1633_v5 = vpack.c.bf16 %v1612_v0, %v1611_v63 }
 0x2ce   :  { %v2753_v7 = vpop.f32.mrb[47].mxu1 }
 0x2cf   :  { %v1553_v21 = vadd.f32 %v2751_v3, %v3967_v6  ;;  %v2754_v8 = vadd.f32 %v2753_v7, %v2752_v4  ;;  %2859 = vmatprep.mubr.bf16.mxu1 %v1633_v5 }
 0x2d1   :  { %v1556_v9 = vadd.f32 %v2754_v8, %v3967_v6  ;;  %v1613_v22 = vmax.f32 %v1553_v21, 0.0 }
 0x2d3   :  { %v1614_v10 = vmax.f32 %v1556_v9, 0.0  ;;  %v2755_v11 = vpop.f32.mrb[48].mxu1 }
 0x2d4   :  { %v2756_v12 = vpop.f32.mrb[49].mxu1 }
 0x2d5   :  { %v2757_v13 = vadd.f32 %v2756_v12, %v2755_v11  ;;  %v2758_v14 = vpop.f32.mrb[50].mxu1  ;;  %v1634_v15 = vpack.c.bf16 %v1614_v10, %v1613_v22 }
 0x2d6   :  { %v2759_v16 = vpop.f32.mrb[51].mxu1 }
 0x2d7   :  { %v1561_v17 = vadd.f32 %v2757_v13, %v3967_v6  ;;  %v2760_v18 = vadd.f32 %v2759_v16, %v2758_v14  ;;  %2860 = vmatmul.mubr.bf16.gmra.mrb[84].mxu1 %v1634_v15 }
 0x2d9   :  { %v1564_v19 = vadd.f32 %v2760_v18, %v3967_v6  ;;  %v1615_v20 = vmax.f32 %v1561_v17, 0.0 }
 0x2db   :  { %v1616_v23 = vmax.f32 %v1564_v19, 0.0  ;;  %v2761_v24 = vpop.f32.mrb[52].mxu1 }
 0x2dc   :  { %v2762_v26 = vpop.f32.mrb[53].mxu1 }
 0x2dd   :  { %v2763_v27 = vadd.f32 %v2762_v26, %v2761_v24  ;;  %v2764_v28 = vpop.f32.mrb[54].mxu1  ;;  %v1635_v29 = vpack.c.bf16 %v1616_v23, %v1615_v20 }
 0x2de   :  { %v2765_v30 = vpop.f32.mrb[55].mxu1 }
 0x2df   :  { %v1569_v31 = vadd.f32 %v2763_v27, %v3967_v6  ;;  %v2766_v32 = vadd.f32 %v2765_v30, %v2764_v28  ;;  %2863 = vmatprep.mubr.bf16.mxu1 %v1635_v29 }
 0x2e1   :  { %v1572_v34 = vadd.f32 %v2766_v32, %v3967_v6  ;;  %v1617_v35 = vmax.f32 %v1569_v31, 0.0 }
 0x2e3   :  { %v1618_v36 = vmax.f32 %v1572_v34, 0.0  ;;  %v2767_v37 = vpop.f32.mrb[56].mxu1 }
 0x2e4   :  { %v2768_v38 = vpop.f32.mrb[57].mxu1 }
 0x2e5   :  { %v2769_v39 = vadd.f32 %v2768_v38, %v2767_v37  ;;  %v2770_v40 = vpop.f32.mrb[58].mxu1  ;;  %v1636_v41 = vpack.c.bf16 %v1618_v36, %v1617_v35 }
 0x2e6   :  { %v2771_v42 = vpop.f32.mrb[59].mxu1 }
 0x2e7   :  { %v1577_v43 = vadd.f32 %v2769_v39, %v3967_v6  ;;  %v2772_v44 = vadd.f32 %v2771_v42, %v2770_v40  ;;  %2864 = vmatmul.mubr.bf16.gmra.mrb[88].mxu1 %v1636_v41 }
 0x2e9   :  { %v1580_v45 = vadd.f32 %v2772_v44, %v3967_v6  ;;  %v1619_v46 = vmax.f32 %v1577_v43, 0.0 }
 0x2eb   :  { %v1620_v47 = vmax.f32 %v1580_v45, 0.0  ;;  %v2773_v48 = vpop.f32.mrb[60].mxu1 }
 0x2ec   :  { %v2774_v49 = vpop.f32.mrb[61].mxu1 }
 0x2ed   :  { %v2775_v50 = vadd.f32 %v2774_v49, %v2773_v48  ;;  %v2776_v51 = vpop.f32.mrb[62].mxu1  ;;  %v1637_v52 = vpack.c.bf16 %v1620_v47, %v1619_v46 }
 0x2ee   :  { %v2777_v53 = vpop.f32.mrb[63].mxu1 }
 0x2ef   :  { %v1585_v54 = vadd.f32 %v2775_v50, %v3967_v6  ;;  %v2778_v55 = vadd.f32 %v2777_v53, %v2776_v51  ;;  %2867 = vmatprep.mubr.bf16.mxu1 %v1637_v52 }
 0x2f1   :  { %v1588_v56 = vadd.f32 %v2778_v55, %v3967_v6  ;;  %v1621_v57 = vmax.f32 %v1585_v54, 0.0 }
 0x2f3   :  { %v1622_v58 = vmax.f32 %v1588_v56, 0.0 }
 0x2f5   :  { %v1638_v59 = vpack.c.bf16 %v1622_v58, %v1621_v57 }
 0x2f7   :  { %2868 = vmatmul.mubr.bf16.gmra.mrb[92].mxu1 %v1638_v59 }
 0x35a   :  { %v2841_v61 = vpop.f32.mrb[64].mxu1 }
 0x35b   :  { %v1753_v62 = vadd.f32 %v2841_v61, %v4016_v60  ;;  %v1744_v63 = vpop.f32.mrb[65].mxu1 }
 0x35c   :  { %v1745_v0 = vadd.f32 %v4016_v60, %v1744_v63  ;;  %v2842_v1 = vpop.f32.mrb[66].mxu1 }
 0x35d   :  { %v1756_v2 = vadd.f32 %v2842_v1, %v4016_v60  ;;  %v1747_v3 = vpop.f32.mrb[67].mxu1  ;;  %v1873_v4 = vmax.f32 %v1753_v62, 0.0 }
 0x35e   :  { %v1748_v6 = vadd.f32 %v4016_v60, %v1747_v3  ;;  %v1871_v7 = vmax.f32 %v1745_v0, 0.0 }
 0x35f   :  { %v1874_v5 = vmax.f32 %v1756_v2, 0.0 }
 0x360   :  { %v1872_v21 = vmax.f32 %v1748_v6, 0.0 }
 0x361   :  { %v1904_v8 = vpack.c.bf16 %v1874_v5, %v1873_v4 }
 0x362   :  { %v1903_v9 = vpack.c.bf16 %v1872_v21, %v1871_v7 }
 0x364   :  { %2879 = vmatprep.mubr.msk.bf16.mxu1 %vm1958_vm0, %v1903_v9 }
 0x365   :  { %2880 = vmatmul.mubr.msk.bf16.vlgmr.msra.gmra.mrb[96].mxu1 %vm1958_vm0, %v1904_v8 }
 0x36a   :  { %v2845_v22 = vpop.f32.mrb[68].mxu1 }
 0x36b   :  { %v1769_v10 = vadd.f32 %v2845_v22, %v4016_v60  ;;  %v1760_v11 = vpop.f32.mrb[69].mxu1 }
 0x36c   :  { %v1761_v12 = vadd.f32 %v4016_v60, %v1760_v11  ;;  %v2846_v13 = vpop.f32.mrb[70].mxu1 }
 0x36d   :  { %v1772_v14 = vadd.f32 %v2846_v13, %v4016_v60  ;;  %v1763_v15 = vpop.f32.mrb[71].mxu1  ;;  %v1877_v17 = vmax.f32 %v1769_v10, 0.0 }
 0x36e   :  { %v1764_v16 = vadd.f32 %v4016_v60, %v1763_v15  ;;  %v1875_v19 = vmax.f32 %v1761_v12, 0.0 }
 0x36f   :  { %v1878_v18 = vmax.f32 %v1772_v14, 0.0 }
 0x370   :  { %v1876_v20 = vmax.f32 %v1764_v16, 0.0 }
 0x371   :  { %v1906_v23 = vpack.c.bf16 %v1878_v18, %v1877_v17 }
 0x372   :  { %v1905_v24 = vpack.c.bf16 %v1876_v20, %v1875_v19 }
 0x374   :  { %2883 = vmatprep.mubr.msk.bf16.mxu1 %vm1958_vm0, %v1905_v24 }
 0x375   :  { %2884 = vmatmul.mubr.msk.bf16.gmra.mrb[100].mxu1 %vm1958_vm0, %v1906_v23 }
 0x37a   :  { %v2849_v25 = vpop.f32.mrb[72].mxu1 }
 0x37b   :  { %v1785_v26 = vadd.f32 %v2849_v25, %v4016_v60  ;;  %v1776_v27 = vpop.f32.mrb[73].mxu1 }
 0x37c   :  { %v1777_v28 = vadd.f32 %v4016_v60, %v1776_v27  ;;  %v2850_v29 = vpop.f32.mrb[74].mxu1 }
 0x37d   :  { %v1788_v30 = vadd.f32 %v2850_v29, %v4016_v60  ;;  %v1779_v31 = vpop.f32.mrb[75].mxu1  ;;  %v1881_v33 = vmax.f32 %v1785_v26, 0.0 }
 0x37e   :  { %v1780_v32 = vadd.f32 %v4016_v60, %v1779_v31  ;;  %v1879_v35 = vmax.f32 %v1777_v28, 0.0 }
 0x37f   :  { %v1882_v34 = vmax.f32 %v1788_v30, 0.0 }
 0x380   :  { %v1880_v36 = vmax.f32 %v1780_v32, 0.0 }
 0x381   :  { %v1908_v37 = vpack.c.bf16 %v1882_v34, %v1881_v33 }
 0x382   :  { %v1907_v38 = vpack.c.bf16 %v1880_v36, %v1879_v35 }
 0x384   :  { %2887 = vmatprep.mubr.msk.bf16.mxu1 %vm1958_vm0, %v1907_v38 }
 0x385   :  { %2888 = vmatmul.mubr.msk.bf16.gmra.mrb[104].mxu1 %vm1958_vm0, %v1908_v37 }
 0x38a   :  { %v2853_v39 = vpop.f32.mrb[76].mxu1 }
 0x38b   :  { %v1801_v40 = vadd.f32 %v2853_v39, %v4016_v60  ;;  %v1792_v41 = vpop.f32.mrb[77].mxu1 }
 0x38c   :  { %v1793_v42 = vadd.f32 %v4016_v60, %v1792_v41  ;;  %v2854_v43 = vpop.f32.mrb[78].mxu1 }
 0x38d   :  { %v1804_v44 = vadd.f32 %v2854_v43, %v4016_v60  ;;  %v1795_v45 = vpop.f32.mrb[79].mxu1  ;;  %v1885_v47 = vmax.f32 %v1801_v40, 0.0 }
 0x38e   :  { %v1796_v46 = vadd.f32 %v4016_v60, %v1795_v45  ;;  %v1883_v49 = vmax.f32 %v1793_v42, 0.0 }
 0x38f   :  { %v1886_v48 = vmax.f32 %v1804_v44, 0.0 }
 0x390   :  { %v1884_v50 = vmax.f32 %v1796_v46, 0.0  ;;  %v4069_v46 = vld [vmem:[%s4463_s8] ss:$0 sm:$0xff] }
 0x391   :  { %v1910_v51 = vpack.c.bf16 %v1886_v48, %v1885_v47 }
 0x392   :  { %v1909_v52 = vpack.c.bf16 %v1884_v50, %v1883_v49 }
 0x394   :  { %2891 = vmatprep.mubr.msk.bf16.mxu1 %vm1958_vm0, %v1909_v52 }
 0x395   :  { %2892 = vmatmul.mubr.msk.bf16.gmra.mrb[108].mxu1 %vm1958_vm0, %v1910_v51 }
 0x39a   :  { %v2857_v53 = vpop.f32.mrb[80].mxu1 }
 0x39b   :  { %v1817_v54 = vadd.f32 %v2857_v53, %v4016_v60  ;;  %v1808_v55 = vpop.f32.mrb[81].mxu1 }
 0x39c   :  { %v1809_v56 = vadd.f32 %v4016_v60, %v1808_v55  ;;  %v2858_v57 = vpop.f32.mrb[82].mxu1 }
 0x39d   :  { %v1820_v58 = vadd.f32 %v2858_v57, %v4016_v60  ;;  %v1811_v59 = vpop.f32.mrb[83].mxu1  ;;  %v1889_v62 = vmax.f32 %v1817_v54, 0.0 }
 0x39e   :  { %v1812_v61 = vadd.f32 %v4016_v60, %v1811_v59  ;;  %v1887_v0 = vmax.f32 %v1809_v56, 0.0 }
 0x39f   :  { %v1890_v63 = vmax.f32 %v1820_v58, 0.0 }
 0x3a0   :  { %v1888_v1 = vmax.f32 %v1812_v61, 0.0 }
 0x3a1   :  { %v1912_v2 = vpack.c.bf16 %v1890_v63, %v1889_v62 }
 0x3a2   :  { %v1911_v3 = vpack.c.bf16 %v1888_v1, %v1887_v0 }
 0x3a4   :  { %2895 = vmatprep.mubr.msk.bf16.mxu1 %vm1958_vm0, %v1911_v3 }
 0x3a5   :  { %2896 = vmatmul.mubr.msk.bf16.gmra.mrb[112].mxu1 %vm1958_vm0, %v1912_v2 }
 0x3aa   :  { %v2861_v6 = vpop.f32.mrb[84].mxu1 }
 0x3ab   :  { %v1833_v4 = vadd.f32 %v2861_v6, %v4016_v60  ;;  %v1824_v5 = vpop.f32.mrb[85].mxu1 }
 0x3ac   :  { %v1825_v7 = vadd.f32 %v4016_v60, %v1824_v5  ;;  %v2862_v21 = vpop.f32.mrb[86].mxu1 }
 0x3ad   :  { %v1836_v8 = vadd.f32 %v2862_v21, %v4016_v60  ;;  %v1827_v9 = vpop.f32.mrb[87].mxu1  ;;  %v1893_v10 = vmax.f32 %v1833_v4, 0.0 }
 0x3ae   :  { %v1828_v22 = vadd.f32 %v4016_v60, %v1827_v9  ;;  %v1891_v12 = vmax.f32 %v1825_v7, 0.0 }
 0x3af   :  { %v1894_v11 = vmax.f32 %v1836_v8, 0.0 }
 0x3b0   :  { %v1892_v13 = vmax.f32 %v1828_v22, 0.0 }
 0x3b1   :  { %v1914_v14 = vpack.c.bf16 %v1894_v11, %v1893_v10 }
 0x3b2   :  { %v1913_v15 = vpack.c.bf16 %v1892_v13, %v1891_v12 }
 0x3b4   :  { %2899 = vmatprep.mubr.msk.bf16.mxu1 %vm1958_vm0, %v1913_v15 }
 0x3b5   :  { %2900 = vmatmul.mubr.msk.bf16.gmra.mrb[116].mxu1 %vm1958_vm0, %v1914_v14 }
 0x3ba   :  { %v2865_v16 = vpop.f32.mrb[88].mxu1 }
 0x3bb   :  { %v1849_v17 = vadd.f32 %v2865_v16, %v4016_v60  ;;  %v1840_v18 = vpop.f32.mrb[89].mxu1 }
 0x3bc   :  { %v1841_v19 = vadd.f32 %v4016_v60, %v1840_v18  ;;  %v2866_v20 = vpop.f32.mrb[90].mxu1 }
 0x3bd   :  { %v1852_v23 = vadd.f32 %v2866_v20, %v4016_v60  ;;  %v1843_v24 = vpop.f32.mrb[91].mxu1  ;;  %v1897_v26 = vmax.f32 %v1849_v17, 0.0 }
 0x3be   :  { %v1844_v25 = vadd.f32 %v4016_v60, %v1843_v24  ;;  %v1895_v28 = vmax.f32 %v1841_v19, 0.0 }
 0x3bf   :  { %v1898_v27 = vmax.f32 %v1852_v23, 0.0 }
 0x3c0   :  { %v1896_v29 = vmax.f32 %v1844_v25, 0.0 }
 0x3c1   :  { %v1916_v30 = vpack.c.bf16 %v1898_v27, %v1897_v26 }
 0x3c2   :  { %v1915_v31 = vpack.c.bf16 %v1896_v29, %v1895_v28 }
 0x3c4   :  { %2903 = vmatprep.mubr.msk.bf16.mxu1 %vm1958_vm0, %v1915_v31 }
 0x3c5   :  { %2904 = vmatmul.mubr.msk.bf16.gmra.mrb[120].mxu1 %vm1958_vm0, %v1916_v30 }
 0x3ca   :  { %v2869_v32 = vpop.f32.mrb[92].mxu1 }
 0x3cb   :  { %v1865_v33 = vadd.f32 %v2869_v32, %v4016_v60  ;;  %v1856_v34 = vpop.f32.mrb[93].mxu1 }
 0x3cc   :  { %v1857_v35 = vadd.f32 %v4016_v60, %v1856_v34  ;;  %v2870_v36 = vpop.f32.mrb[94].mxu1 }
 0x3cd   :  { %v1868_v37 = vadd.f32 %v2870_v36, %v4016_v60  ;;  %v1859_v38 = vpop.f32.mrb[95].mxu1  ;;  %v1901_v40 = vmax.f32 %v1865_v33, 0.0 }
 0x3ce   :  { %v1860_v39 = vadd.f32 %v4016_v60, %v1859_v38  ;;  %v1899_v42 = vmax.f32 %v1857_v35, 0.0 }
 0x3cf   :  { %v1902_v41 = vmax.f32 %v1868_v37, 0.0 }
 0x3d0   :  { %v1900_v43 = vmax.f32 %v1860_v39, 0.0 }
 0x3d1   :  { %v1918_v44 = vpack.c.bf16 %v1902_v41, %v1901_v40 }
 0x3d2   :  { %v1917_v45 = vpack.c.bf16 %v1900_v43, %v1899_v42 }
 0x3d4   :  { %2907 = vmatprep.mubr.msk.bf16.mxu1 %vm1958_vm0, %v1917_v45 }
 0x3d5   :  { %2908 = vmatmul.mubr.msk.bf16.gmra.mrb[124].mxu1 %vm1958_vm0, %v1918_v44 }
 0x438   :  { %v2881_v47 = vpop.f32.mrb[96].mxu1 }
 0x439   :  { %v4072_v48 = vadd.f32 %v2881_v47, %v4069_v46  ;;  %v2041_v60 = vpop.f32.mrb[97].mxu1 }
 0x43a   :  { %v4075_v49 = vadd.f32 %v4069_v46, %v2041_v60  ;;  %v2882_v50 = vpop.f32.mrb[98].mxu1 }
 0x43b   :  { %2172 = vmax.xlane.f32.xlu1 %v4072_v48  ;;  %v2044_v51 = vpop.f32.mrb[99].mxu1  ;;  %v4080_v52 = vadd.f32 %v2882_v50, %v4069_v46 }
 0x43c   :  { %2168 = vmax.xlane.f32.xlu0 %v4075_v49  ;;  %v4083_v53 = vadd.f32 %v4069_v46, %v2044_v51 }
 0x43f   :  { %2174 = vmax.xlane.f32.xlu1 %v4080_v52 }
 0x440   :  { %2170 = vmax.xlane.f32.xlu0 %v4083_v53 }
 0x448   :  { %v2885_v54 = vpop.f32.mrb[100].mxu1 }
 0x449   :  { %v4088_v55 = vadd.f32 %v2885_v54, %v4069_v46  ;;  %v2057_v56 = vpop.f32.mrb[101].mxu1 }
 0x44a   :  { %v2886_v57 = vpop.f32.mrb[102].mxu1  ;;  %v4095_v61 = vadd.f32 %v4069_v46, %v2057_v56 }
 0x44b   :  { %v4091_v58 = vadd.f32 %v2886_v57, %v4069_v46  ;;  %v2060_v59 = vpop.f32.mrb[103].mxu1  ;;  %2180 = vmax.xlane.f32.xlu0 %v4088_v55 }
 0x44c   :  { %v4099_v62 = vadd.f32 %v4069_v46, %v2060_v59 }
 0x44d   :  { %2182 = vmax.xlane.f32.xlu1 %v4091_v58 }
 0x44f   :  { %2176 = vmax.xlane.f32.xlu0 %v4095_v61 }
 0x451   :  { %2178 = vmax.xlane.f32.xlu1 %v4099_v62 }
 0x458   :  { %v2889_v63 = vpop.f32.mrb[104].mxu1 }
 0x459   :  { %v4104_v0 = vadd.f32 %v2889_v63, %v4069_v46  ;;  %v2073_v1 = vpop.f32.mrb[105].mxu1 }
 0x45a   :  { %v2890_v2 = vpop.f32.mrb[106].mxu1  ;;  %v4111_v4 = vadd.f32 %v4069_v46, %v2073_v1 }
 0x45b   :  { %v4107_v3 = vadd.f32 %v2890_v2, %v4069_v46  ;;  %v2076_v6 = vpop.f32.mrb[107].mxu1  ;;  %2188 = vmax.xlane.f32.xlu0 %v4104_v0 }
 0x45c   :  { %v4115_v5 = vadd.f32 %v4069_v46, %v2076_v6 }
 0x45d   :  { %2190 = vmax.xlane.f32.xlu1 %v4107_v3 }
 0x45f   :  { %2184 = vmax.xlane.f32.xlu0 %v4111_v4 }
 0x461   :  { %2186 = vmax.xlane.f32.xlu1 %v4115_v5 }
 0x468   :  { %v2893_v7 = vpop.f32.mrb[108].mxu1 }
 0x469   :  { %v4120_v21 = vadd.f32 %v2893_v7, %v4069_v46  ;;  %v2089_v8 = vpop.f32.mrb[109].mxu1 }
 0x46a   :  { %v2894_v9 = vpop.f32.mrb[110].mxu1  ;;  %v4127_v11 = vadd.f32 %v4069_v46, %v2089_v8 }
 0x46b   :  { %v4123_v22 = vadd.f32 %v2894_v9, %v4069_v46  ;;  %v2092_v10 = vpop.f32.mrb[111].mxu1  ;;  %2196 = vmax.xlane.f32.xlu0 %v4120_v21 }
 0x46c   :  { %v4131_v12 = vadd.f32 %v4069_v46, %v2092_v10 }
 0x46d   :  { %2198 = vmax.xlane.f32.xlu1 %v4123_v22 }
 0x46f   :  { %2192 = vmax.xlane.f32.xlu0 %v4127_v11 }
 0x471   :  { %2194 = vmax.xlane.f32.xlu1 %v4131_v12 }
 0x478   :  { %v2897_v13 = vpop.f32.mrb[112].mxu1 }
 0x479   :  { %v4136_v14 = vadd.f32 %v2897_v13, %v4069_v46  ;;  %v2105_v15 = vpop.f32.mrb[113].mxu1 }
 0x47a   :  { %v2898_v16 = vpop.f32.mrb[114].mxu1  ;;  %v4143_v19 = vadd.f32 %v4069_v46, %v2105_v15 }
 0x47b   :  { %v4139_v17 = vadd.f32 %v2898_v16, %v4069_v46  ;;  %v2108_v18 = vpop.f32.mrb[115].mxu1  ;;  %2204 = vmax.xlane.f32.xlu0 %v4136_v14 }
 0x47c   :  { %v4147_v20 = vadd.f32 %v4069_v46, %v2108_v18 }
 0x47d   :  { %2206 = vmax.xlane.f32.xlu1 %v4139_v17 }
 0x47f   :  { %2200 = vmax.xlane.f32.xlu0 %v4143_v19 }
 0x481   :  { %2202 = vmax.xlane.f32.xlu1 %v4147_v20 }
 0x488   :  { %v2901_v23 = vpop.f32.mrb[116].mxu1 }
 0x489   :  { %v4152_v24 = vadd.f32 %v2901_v23, %v4069_v46  ;;  %v2121_v25 = vpop.f32.mrb[117].mxu1 }
 0x48a   :  { %v2902_v26 = vpop.f32.mrb[118].mxu1  ;;  %v4159_v29 = vadd.f32 %v4069_v46, %v2121_v25 }
 0x48b   :  { %v4155_v27 = vadd.f32 %v2902_v26, %v4069_v46  ;;  %v2124_v28 = vpop.f32.mrb[119].mxu1  ;;  %2212 = vmax.xlane.f32.xlu0 %v4152_v24 }
 0x48c   :  { %v4163_v30 = vadd.f32 %v4069_v46, %v2124_v28 }
 0x48d   :  { %2214 = vmax.xlane.f32.xlu1 %v4155_v27 }
 0x48f   :  { %2208 = vmax.xlane.f32.xlu0 %v4159_v29 }
 0x491   :  { %2210 = vmax.xlane.f32.xlu1 %v4163_v30 }
 0x498   :  { %v2905_v31 = vpop.f32.mrb[120].mxu1 }
 0x499   :  { %v4168_v32 = vadd.f32 %v2905_v31, %v4069_v46  ;;  %v2137_v33 = vpop.f32.mrb[121].mxu1 }
 0x49a   :  { %v2906_v34 = vpop.f32.mrb[122].mxu1  ;;  %v4175_v37 = vadd.f32 %v4069_v46, %v2137_v33 }
 0x49b   :  { %v4171_v35 = vadd.f32 %v2906_v34, %v4069_v46  ;;  %v2140_v36 = vpop.f32.mrb[123].mxu1  ;;  %2220 = vmax.xlane.f32.xlu0 %v4168_v32 }
 0x49c   :  { %v4179_v38 = vadd.f32 %v4069_v46, %v2140_v36 }
 0x49d   :  { %2222 = vmax.xlane.f32.xlu1 %v4171_v35 }
 0x49f   :  { %2216 = vmax.xlane.f32.xlu0 %v4175_v37 }
 0x4a1   :  { %2218 = vmax.xlane.f32.xlu1 %v4179_v38 }
 0x4a8   :  { %v2909_v39 = vpop.f32.mrb[124].mxu1 }
 0x4a9   :  { %v2153_v40 = vpop.f32.mrb[125].mxu1  ;;  %v4191_v45 = vadd.f32 %v2909_v39, %v4069_v46 }
 0x4aa   :  { %v4184_v41 = vadd.f32 %v4069_v46, %v2153_v40  ;;  %v2910_v42 = vpop.f32.mrb[126].mxu1 }
 0x4ab   :  { %v2156_v43 = vpop.f32.mrb[127].mxu1  ;;  %v4195_v47 = vadd.f32 %v2910_v42, %v4069_v46 }
 0x4ac   :  { %v4187_v44 = vadd.f32 %v4069_v46, %v2156_v43  ;;  %2224 = vmax.xlane.f32.xlu0 %v4184_v41 }
 0x4ae   :  { %2226 = vmax.xlane.f32.xlu1 %v4187_v44 }
 0x4b0   :  { %2228 = vmax.xlane.f32.xlu0 %v4191_v45 }
 0x4b2   :  { %2230 = vmax.xlane.f32.xlu1 %v4195_v47 }
 0x4c8   :  { %v2173_v60 = vpop.xlane.xlu1 %2172 }
 0x4c9   :  { %v2234_v50 = vsub.f32 %v4072_v48, %v2173_v60  ;;  %v2169_v51 = vpop.xlane.xlu0 %2168 }
 0x4ca   :  { %v2232_v54 = vsub.f32 %v4075_v49, %v2169_v51 }
 0x4cb   :  { %v2268_v56 = vmul.f32 1.442695, %v2234_v50 }
 0x4cc   :  { %v2264_v57 = vmul.f32 1.442695, %v2232_v54  ;;  %v2175_v59 = vpop.xlane.xlu1 %2174 }
 0x4cd   :  { %3259 = vpow2.f32 %v2268_v56  ;;  %v2235_v63 = vsub.f32 %v4080_v52, %v2175_v59  ;;  %v2171_v1 = vpop.xlane.xlu0 %2170 }
 0x4ce   :  { %v2233_v46 = vsub.f32 %v4083_v53, %v2171_v1  ;;  %3261 = vpow2.f32 %v2264_v57 }
 0x4cf   :  { %v2270_v2 = vmul.f32 1.442695, %v2235_v63 }
 0x4d0   :  { %v2266_v6 = vmul.f32 1.442695, %v2233_v46 }
 0x4d1   :  { %3263 = vpow2.f32 %v2270_v2 }
 0x4d2   :  { %3265 = vpow2.f32 %v2266_v6 }
 0x4d7   :  { %v4203_v7 = vpop.eup %3259 }
 0x4d8   :  { %2332 = vadd.xlane.f32.xlu0 %v4203_v7  ;;  %v2181_v48 = vpop.xlane.xlu0 %2180  ;;  %v4207_v8 = vpop.eup %3261 }
 0x4d9   :  { %v2238_v49 = vsub.f32 %v4088_v55, %v2181_v48 }
 0x4da   :  { %v2183_v9 = vpop.xlane.xlu1 %2182 }
 0x4db   :  { %v4209_v10 = vpop.eup %3263  ;;  %v2276_v52 = vmul.f32 1.442695, %v2238_v49  ;;  %v2239_v53 = vsub.f32 %v4091_v58, %v2183_v9 }
 0x4dc   :  { %2334 = vadd.xlane.f32.xlu1 %v4209_v10  ;;  %2328 = vadd.xlane.f32.xlu0 %v4207_v8  ;;  %v2177_v13 = vpop.xlane.xlu0 %2176  ;;  %v4215_v23 = vpop.eup %3265 }
 0x4dd   :  { %3267 = vpow2.f32 %v2276_v52  ;;  %v2278_v15 = vmul.f32 1.442695, %v2239_v53  ;;  %v2236_v16 = vsub.f32 %v4095_v61, %v2177_v13 }
 0x4de   :  { %v2179_v18 = vpop.xlane.xlu1 %2178 }
 0x4df   :  { %3269 = vpow2.f32 %v2278_v15  ;;  %v2272_v55 = vmul.f32 1.442695, %v2236_v16  ;;  %v2237_v25 = vsub.f32 %v4099_v62, %v2179_v18 }
 0x4e0   :  { %2330 = vadd.xlane.f32.xlu1 %v4215_v23 }
 0x4e1   :  { %3271 = vpow2.f32 %v2272_v55  ;;  %v2274_v58 = vmul.f32 1.442695, %v2237_v25 }
 0x4e3   :  { %3273 = vpow2.f32 %v2274_v58 }
 0x4e7   :  { %v4219_v26 = vpop.eup %3267 }
 0x4e8   :  { %2340 = vadd.xlane.f32.xlu0 %v4219_v26  ;;  %v2189_v28 = vpop.xlane.xlu0 %2188 }
 0x4e9   :  { %v4222_v31 = vpop.eup %3269  ;;  %v2242_v61 = vsub.f32 %v4104_v0, %v2189_v28 }
 0x4ea   :  { %v2191_v33 = vpop.xlane.xlu1 %2190  ;;  %2342 = vadd.xlane.f32.xlu1 %v4222_v31 }
 0x4eb   :  { %v4226_v34 = vpop.eup %3271  ;;  %v2284_v62 = vmul.f32 1.442695, %v2242_v61  ;;  %v2243_v36 = vsub.f32 %v4107_v3, %v2191_v33 }
 0x4ec   :  { %2336 = vadd.xlane.f32.xlu0 %v4226_v34  ;;  %v2185_v39 = vpop.xlane.xlu0 %2184 }
 0x4ed   :  { %v4230_v40 = vpop.eup %3273  ;;  %3275 = vpow2.f32 %v2284_v62  ;;  %v2286_v42 = vmul.f32 1.442695, %v2243_v36  ;;  %v2240_v43 = vsub.f32 %v4111_v4, %v2185_v39 }
 0x4ee   :  { %v2187_v60 = vpop.xlane.xlu1 %2186  ;;  %2338 = vadd.xlane.f32.xlu1 %v4230_v40 }
 0x4ef   :  { %3277 = vpow2.f32 %v2286_v42  ;;  %v2280_v0 = vmul.f32 1.442695, %v2240_v43  ;;  %v2241_v50 = vsub.f32 %v4115_v5, %v2187_v60 }
 0x4f1   :  { %3279 = vpow2.f32 %v2280_v0  ;;  %v2282_v51 = vmul.f32 1.442695, %v2241_v50 }
 0x4f3   :  { %3281 = vpow2.f32 %v2282_v51 }
 0x4f7   :  { %v4235_v3 = vpop.eup %3275 }
 0x4f8   :  { %2348 = vadd.xlane.f32.xlu0 %v4235_v3  ;;  %v2197_v54 = vpop.xlane.xlu0 %2196 }
 0x4f9   :  { %v4238_v56 = vpop.eup %3277  ;;  %v2246_v57 = vsub.f32 %v4120_v21, %v2197_v54 }
 0x4fa   :  { %v2199_v4 = vpop.xlane.xlu1 %2198  ;;  %2350 = vadd.xlane.f32.xlu1 %v4238_v56 }
 0x4fb   :  { %v4242_v59 = vpop.eup %3279  ;;  %v2292_v63 = vmul.f32 1.442695, %v2246_v57  ;;  %v2247_v5 = vsub.f32 %v4123_v22, %v2199_v4 }
 0x4fc   :  { %2344 = vadd.xlane.f32.xlu0 %v4242_v59  ;;  %v2193_v1 = vpop.xlane.xlu0 %2192 }
 0x4fd   :  { %v4246_v46 = vpop.eup %3281  ;;  %3283 = vpow2.f32 %v2292_v63  ;;  %v2294_v2 = vmul.f32 1.442695, %v2247_v5  ;;  %v2244_v6 = vsub.f32 %v4127_v11, %v2193_v1 }
 0x4fe   :  { %v2195_v48 = vpop.xlane.xlu1 %2194  ;;  %2346 = vadd.xlane.f32.xlu1 %v4246_v46 }
 0x4ff   :  { %3285 = vpow2.f32 %v2294_v2  ;;  %v2288_v21 = vmul.f32 1.442695, %v2244_v6  ;;  %v2245_v49 = vsub.f32 %v4131_v12, %v2195_v48 }
 0x501   :  { %3287 = vpow2.f32 %v2288_v21  ;;  %v2290_v9 = vmul.f32 1.442695, %v2245_v49 }
 0x503   :  { %3289 = vpow2.f32 %v2290_v9 }
 0x507   :  { %v4251_v22 = vpop.eup %3283 }
 0x508   :  { %2356 = vadd.xlane.f32.xlu0 %v4251_v22  ;;  %v2205_v52 = vpop.xlane.xlu0 %2204 }
 0x509   :  { %v4254_v53 = vpop.eup %3285  ;;  %v2250_v13 = vsub.f32 %v4136_v14, %v2205_v52 }
 0x50a   :  { %v2207_v11 = vpop.xlane.xlu1 %2206  ;;  %2358 = vadd.xlane.f32.xlu1 %v4254_v53 }
 0x50b   :  { %v4258_v15 = vpop.eup %3287  ;;  %v2300_v16 = vmul.f32 1.442695, %v2250_v13  ;;  %v2251_v12 = vsub.f32 %v4139_v17, %v2207_v11 }
 0x50c   :  { %2352 = vadd.xlane.f32.xlu0 %v4258_v15  ;;  %v2201_v18 = vpop.xlane.xlu0 %2200 }
 0x50d   :  { %v4262_v55 = vpop.eup %3289  ;;  %3291 = vpow2.f32 %v2300_v16  ;;  %v2302_v25 = vmul.f32 1.442695, %v2251_v12  ;;  %v2248_v58 = vsub.f32 %v4143_v19, %v2201_v18 }
 0x50e   :  { %v2203_v28 = vpop.xlane.xlu1 %2202  ;;  %2354 = vadd.xlane.f32.xlu1 %v4262_v55 }
 0x50f   :  { %3293 = vpow2.f32 %v2302_v25  ;;  %v2296_v14 = vmul.f32 1.442695, %v2248_v58  ;;  %v2249_v61 = vsub.f32 %v4147_v20, %v2203_v28 }
 0x511   :  { %3295 = vpow2.f32 %v2296_v14  ;;  %v2298_v33 = vmul.f32 1.442695, %v2249_v61 }
 0x513   :  { %3297 = vpow2.f32 %v2298_v33 }
 0x517   :  { %v4267_v17 = vpop.eup %3291 }
 0x518   :  { %2364 = vadd.xlane.f32.xlu0 %v4267_v17  ;;  %v2213_v62 = vpop.xlane.xlu0 %2212 }
 0x519   :  { %v4270_v36 = vpop.eup %3293  ;;  %v2254_v39 = vsub.f32 %v4152_v24, %v2213_v62 }
 0x51a   :  { %v2215_v19 = vpop.xlane.xlu1 %2214  ;;  %2366 = vadd.xlane.f32.xlu1 %v4270_v36 }
 0x51b   :  { %v4274_v42 = vpop.eup %3295  ;;  %v2308_v43 = vmul.f32 1.442695, %v2254_v39  ;;  %v2255_v20 = vsub.f32 %v4155_v27, %v2215_v19 }
 0x51c   :  { %2360 = vadd.xlane.f32.xlu0 %v4274_v42  ;;  %v2209_v60 = vpop.xlane.xlu0 %2208 }
 0x51d   :  { %v4278_v0 = vpop.eup %3297  ;;  %3299 = vpow2.f32 %v2308_v43  ;;  %v2310_v50 = vmul.f32 1.442695, %v2255_v20  ;;  %v2252_v51 = vsub.f32 %v4159_v29, %v2209_v60 }
 0x51e   :  { %v2211_v54 = vpop.xlane.xlu1 %2210  ;;  %2362 = vadd.xlane.f32.xlu1 %v4278_v0 }
 0x51f   :  { %3301 = vpow2.f32 %v2310_v50  ;;  %v2304_v24 = vmul.f32 1.442695, %v2252_v51  ;;  %v2253_v57 = vsub.f32 %v4163_v30, %v2211_v54 }
 0x521   :  { %3303 = vpow2.f32 %v2304_v24  ;;  %v2306_v4 = vmul.f32 1.442695, %v2253_v57 }
 0x523   :  { %3305 = vpow2.f32 %v2306_v4 }
 0x527   :  { %v4283_v27 = vpop.eup %3299 }
 0x528   :  { %2372 = vadd.xlane.f32.xlu0 %v4283_v27  ;;  %v2221_v63 = vpop.xlane.xlu0 %2220 }
 0x529   :  { %v4286_v5 = vpop.eup %3301  ;;  %v2258_v1 = vsub.f32 %v4168_v32, %v2221_v63 }
 0x52a   :  { %v2223_v29 = vpop.xlane.xlu1 %2222  ;;  %2374 = vadd.xlane.f32.xlu1 %v4286_v5 }
 0x52b   :  { %v4290_v2 = vpop.eup %3303  ;;  %v2316_v6 = vmul.f32 1.442695, %v2258_v1  ;;  %v2259_v30 = vsub.f32 %v4171_v35, %v2223_v29 }
 0x52c   :  { %2368 = vadd.xlane.f32.xlu0 %v4290_v2  ;;  %v2217_v48 = vpop.xlane.xlu0 %2216 }
 0x52d   :  { %v4294_v21 = vpop.eup %3305  ;;  %3307 = vpow2.f32 %v2316_v6  ;;  %v2318_v49 = vmul.f32 1.442695, %v2259_v30  ;;  %v2256_v9 = vsub.f32 %v4175_v37, %v2217_v48 }
 0x52e   :  { %v2219_v52 = vpop.xlane.xlu1 %2218  ;;  %2370 = vadd.xlane.f32.xlu1 %v4294_v21 }
 0x52f   :  { %3309 = vpow2.f32 %v2318_v49  ;;  %v2312_v32 = vmul.f32 1.442695, %v2256_v9  ;;  %v2257_v13 = vsub.f32 %v4179_v38, %v2219_v52 }
 0x531   :  { %3311 = vpow2.f32 %v2312_v32  ;;  %v2314_v11 = vmul.f32 1.442695, %v2257_v13 }
 0x533   :  { %3313 = vpow2.f32 %v2314_v11 }
 0x537   :  { %v4299_v35 = vpop.eup %3307 }
 0x538   :  { %2380 = vadd.xlane.f32.xlu0 %v4299_v35 }
 0x539   :  { %v4302_v16 = vpop.eup %3309  ;;  %v2225_v12 = vpop.xlane.xlu0 %2224 }
 0x53a   :  { %v2260_v18 = vsub.f32 %v4184_v41, %v2225_v12  ;;  %2382 = vadd.xlane.f32.xlu1 %v4302_v16 }
 0x53b   :  { %v4306_v37 = vpop.eup %3311  ;;  %v2227_v25 = vpop.xlane.xlu1 %2226 }
 0x53c   :  { %v2320_v58 = vmul.f32 1.442695, %v2260_v18  ;;  %v2261_v38 = vsub.f32 %v4187_v44, %v2227_v25  ;;  %2376 = vadd.xlane.f32.xlu0 %v4306_v37 }
 0x53d   :  { %v4310_v28 = vpop.eup %3313  ;;  %v2229_v14 = vpop.xlane.xlu0 %2228 }
 0x53e   :  { %3315 = vpow2.f32 %v2320_v58  ;;  %v2322_v61 = vmul.f32 1.442695, %v2261_v38  ;;  %v2262_v33 = vsub.f32 %v4191_v45, %v2229_v14  ;;  %2378 = vadd.xlane.f32.xlu1 %v4310_v28 }
 0x53f   :  { %v2231_v41 = vpop.xlane.xlu1 %2230 }
 0x540   :  { %3317 = vpow2.f32 %v2322_v61  ;;  %v2324_v62 = vmul.f32 1.442695, %v2262_v33  ;;  %v2263_v39 = vsub.f32 %v4195_v47, %v2231_v41 }
 0x542   :  { %3319 = vpow2.f32 %v2324_v62  ;;  %v2326_v19 = vmul.f32 1.442695, %v2263_v39 }
 0x544   :  { %3321 = vpow2.f32 %v2326_v19 }
 0x548   :  { %v4315_v44 = vpop.eup %3315 }
 0x549   :  { %2384 = vadd.xlane.f32.xlu0 %v4315_v44 }
 0x54a   :  { %v4318_v43 = vpop.eup %3317 }
 0x54b   :  { %2386 = vadd.xlane.f32.xlu1 %v4318_v43 }
 0x54c   :  { %v4321_v20 = vpop.eup %3319 }
 0x54d   :  { %2388 = vadd.xlane.f32.xlu0 %v4321_v20 }
 0x54e   :  { %v4324_v45 = vpop.eup %3321 }
 0x54f   :  { %2390 = vadd.xlane.f32.xlu1 %v4324_v45 }
 0x565   :  { %v2333_v47 = vpop.xlane.xlu0 %2332 }
 0x566   :  { %3323 = vrcp.f32 %v2333_v47 }
 0x569   :  { %v2335_v60 = vpop.xlane.xlu1 %2334  ;;  %v2329_v50 = vpop.xlane.xlu0 %2328 }
 0x56a   :  { %3325 = vrcp.f32 %v2335_v60 }
 0x56b   :  { %3327 = vrcp.f32 %v2329_v50 }
 0x56d   :  { %v2331_v51 = vpop.xlane.xlu1 %2330 }
 0x56e   :  { %3329 = vrcp.f32 %v2331_v51 }
 0x570   :  { %v3324_v54 = vpop.eup %3323 }
 0x571   :  { %v2426_v24 = vmul.f32 %v3324_v54, %v4203_v7 }
 0x573   :  { %2458 = vst [vmem:[%s4464_s9 + $0x10] sm:$0xff] %v2426_v24 }
 0x574   :  { %v3326_v57 = vpop.eup %3325 }
 0x575   :  { %v3328_v4 = vpop.eup %3327  ;;  %v2427_v63 = vmul.f32 %v3326_v57, %v4209_v10  ;;  %v2341_v1 = vpop.xlane.xlu0 %2340 }
 0x576   :  { %v2424_v29 = vmul.f32 %v3328_v4, %v4207_v8  ;;  %3331 = vrcp.f32 %v2341_v1 }
 0x577   :  { %2459 = vst [vmem:[%s4464_s9 + $0x18] sm:$0xff] %v2427_v63  ;;  %v2343_v6 = vpop.xlane.xlu1 %2342 }
 0x578   :  { %v3330_v30 = vpop.eup %3329  ;;  %2456 = vst [vmem:[%s4464_s9] sm:$0xff] %v2424_v29  ;;  %3333 = vrcp.f32 %v2343_v6 }
 0x579   :  { %v2425_v7 = vmul.f32 %v3330_v30, %v4215_v23  ;;  %v2337_v48 = vpop.xlane.xlu0 %2336 }
 0x57a   :  { %3335 = vrcp.f32 %v2337_v48 }
 0x57b   :  { %2457 = vst [vmem:[%s4464_s9 + $0x8] sm:$0xff] %v2425_v7  ;;  %v2339_v8 = vpop.xlane.xlu1 %2338 }
 0x57c   :  { %3337 = vrcp.f32 %v2339_v8 }
 0x580   :  { %v3332_v10 = vpop.eup %3331 }
 0x581   :  { %v2430_v49 = vmul.f32 %v3332_v10, %v4219_v26 }
 0x582   :  { %v3334_v9 = vpop.eup %3333 }
 0x583   :  { %2462 = vst [vmem:[%s4464_s9 + $0x30] sm:$0xff] %v2430_v49  ;;  %v2431_v52 = vmul.f32 %v3334_v9, %v4222_v31 }
 0x584   :  { %v3336_v32 = vpop.eup %3335 }
 0x585   :  { %2463 = vst [vmem:[%s4464_s9 + $0x38] sm:$0xff] %v2431_v52  ;;  %v2428_v23 = vmul.f32 %v3336_v32, %v4226_v34  ;;  %v2349_v13 = vpop.xlane.xlu0 %2348 }
 0x586   :  { %v3338_v11 = vpop.eup %3337  ;;  %3339 = vrcp.f32 %v2349_v13 }
 0x587   :  { %2460 = vst [vmem:[%s4464_s9 + $0x20] sm:$0xff] %v2428_v23  ;;  %v2429_v26 = vmul.f32 %v3338_v11, %v4230_v40  ;;  %v2351_v12 = vpop.xlane.xlu1 %2350 }
 0x588   :  { %3341 = vrcp.f32 %v2351_v12 }
 0x589   :  { %2461 = vst [vmem:[%s4464_s9 + $0x28] sm:$0xff] %v2429_v26  ;;  %v2345_v31 = vpop.xlane.xlu0 %2344 }
 0x58a   :  { %3343 = vrcp.f32 %v2345_v31 }
 0x58b   :  { %v2347_v18 = vpop.xlane.xlu1 %2346 }
 0x58c   :  { %3345 = vrcp.f32 %v2347_v18 }
 0x590   :  { %v3340_v34 = vpop.eup %3339 }
 0x591   :  { %v2434_v25 = vmul.f32 %v3340_v34, %v4235_v3 }
 0x592   :  { %v3342_v58 = vpop.eup %3341 }
 0x593   :  { %2466 = vst [vmem:[%s4464_s9 + $0x50] sm:$0xff] %v2434_v25  ;;  %v2435_v40 = vmul.f32 %v3342_v58, %v4238_v56 }
 0x594   :  { %v3344_v38 = vpop.eup %3343 }
 0x595   :  { %2467 = vst [vmem:[%s4464_s9 + $0x58] sm:$0xff] %v2435_v40  ;;  %v2432_v14 = vmul.f32 %v3344_v38, %v4242_v59  ;;  %v2357_v61 = vpop.xlane.xlu0 %2356 }
 0x596   :  { %v3346_v33 = vpop.eup %3345  ;;  %3347 = vrcp.f32 %v2357_v61 }
 0x597   :  { %2464 = vst [vmem:[%s4464_s9 + $0x40] sm:$0xff] %v2432_v14  ;;  %v2433_v3 = vmul.f32 %v3346_v33, %v4246_v46  ;;  %v2359_v41 = vpop.xlane.xlu1 %2358 }
 0x598   :  { %3349 = vrcp.f32 %v2359_v41 }
 0x599   :  { %2465 = vst [vmem:[%s4464_s9 + $0x48] sm:$0xff] %v2433_v3  ;;  %v2353_v56 = vpop.xlane.xlu0 %2352 }
 0x59a   :  { %3351 = vrcp.f32 %v2353_v56 }
 0x59b   :  { %v2355_v62 = vpop.xlane.xlu1 %2354 }
 0x59c   :  { %3353 = vrcp.f32 %v2355_v62 }
 0x5a0   :  { %v3348_v59 = vpop.eup %3347 }
 0x5a1   :  { %v2438_v39 = vmul.f32 %v3348_v59, %v4251_v22 }
 0x5a2   :  { %v3350_v19 = vpop.eup %3349 }
 0x5a3   :  { %2470 = vst [vmem:[%s4464_s9 + $0x70] sm:$0xff] %v2438_v39  ;;  %v2439_v46 = vmul.f32 %v3350_v19, %v4254_v53 }
 0x5a4   :  { %v3352_v47 = vpop.eup %3351 }
 0x5a5   :  { %2471 = vst [vmem:[%s4464_s9 + $0x78] sm:$0xff] %v2439_v46  ;;  %v2436_v60 = vmul.f32 %v3352_v47, %v4258_v15  ;;  %v2365_v50 = vpop.xlane.xlu0 %2364 }
 0x5a6   :  { %v3354_v51 = vpop.eup %3353  ;;  %3355 = vrcp.f32 %v2365_v50 }
 0x5a7   :  { %2468 = vst [vmem:[%s4464_s9 + $0x60] sm:$0xff] %v2436_v60  ;;  %v2437_v22 = vmul.f32 %v3354_v51, %v4262_v55  ;;  %v2367_v54 = vpop.xlane.xlu1 %2366 }
 0x5a8   :  { %3357 = vrcp.f32 %v2367_v54 }
 0x5a9   :  { %2469 = vst [vmem:[%s4464_s9 + $0x68] sm:$0xff] %v2437_v22  ;;  %v2361_v53 = vpop.xlane.xlu0 %2360 }
 0x5aa   :  { %3359 = vrcp.f32 %v2361_v53 }
 0x5ab   :  { %v2363_v24 = vpop.xlane.xlu1 %2362 }
 0x5ac   :  { %3361 = vrcp.f32 %v2363_v24 }
 0x5b0   :  { %v3356_v15 = vpop.eup %3355 }
 0x5b1   :  { %v2442_v57 = vmul.f32 %v3356_v15, %v4267_v17 }
 0x5b2   :  { %v3358_v4 = vpop.eup %3357 }
 0x5b3   :  { %2474 = vst [vmem:[%s4464_s9 + $0x90] sm:$0xff] %v2442_v57  ;;  %v2443_v55 = vmul.f32 %v3358_v4, %v4270_v36 }
 0x5b4   :  { %v3360_v63 = vpop.eup %3359 }
 0x5b5   :  { %2475 = vst [vmem:[%s4464_s9 + $0x98] sm:$0xff] %v2443_v55  ;;  %v2440_v1 = vmul.f32 %v3360_v63, %v4274_v42  ;;  %v2373_v29 = vpop.xlane.xlu0 %2372 }
 0x5b6   :  { %v3362_v6 = vpop.eup %3361  ;;  %3363 = vrcp.f32 %v2373_v29 }
 0x5b7   :  { %2472 = vst [vmem:[%s4464_s9 + $0x80] sm:$0xff] %v2440_v1  ;;  %v2441_v17 = vmul.f32 %v3362_v6, %v4278_v0  ;;  %v2375_v30 = vpop.xlane.xlu1 %2374 }
 0x5b8   :  { %3365 = vrcp.f32 %v2375_v30 }
 0x5b9   :  { %2473 = vst [vmem:[%s4464_s9 + $0x88] sm:$0xff] %v2441_v17  ;;  %v2369_v36 = vpop.xlane.xlu0 %2368 }
 0x5ba   :  { %3367 = vrcp.f32 %v2369_v36 }
 0x5bb   :  { %v2371_v7 = vpop.xlane.xlu1 %2370 }
 0x5bc   :  { %3369 = vrcp.f32 %v2371_v7 }
 0x5c0   :  { %v3364_v42 = vpop.eup %3363 }
 0x5c1   :  { %v2446_v48 = vmul.f32 %v3364_v42, %v4283_v27 }
 0x5c2   :  { %v3366_v8 = vpop.eup %3365 }
 0x5c3   :  { %2478 = vst [vmem:[%s4464_s9 + $0xb0] sm:$0xff] %v2446_v48  ;;  %v2447_v0 = vmul.f32 %v3366_v8, %v4286_v5 }
 0x5c4   :  { %v3368_v10 = vpop.eup %3367 }
 0x5c5   :  { %2479 = vst [vmem:[%s4464_s9 + $0xb8] sm:$0xff] %v2447_v0  ;;  %v2444_v49 = vmul.f32 %v3368_v10, %v4290_v2  ;;  %v2381_v9 = vpop.xlane.xlu0 %2380 }
 0x5c6   :  { %v3370_v52 = vpop.eup %3369  ;;  %3371 = vrcp.f32 %v2381_v9 }
 0x5c7   :  { %2476 = vst [vmem:[%s4464_s9 + $0xa0] sm:$0xff] %v2444_v49  ;;  %v2445_v27 = vmul.f32 %v3370_v52, %v4294_v21  ;;  %v2383_v32 = vpop.xlane.xlu1 %2382 }
 0x5c8   :  { %3373 = vrcp.f32 %v2383_v32 }
 0x5c9   :  { %2477 = vst [vmem:[%s4464_s9 + $0xa8] sm:$0xff] %v2445_v27  ;;  %v2377_v5 = vpop.xlane.xlu0 %2376 }
 0x5ca   :  { %3375 = vrcp.f32 %v2377_v5 }
 0x5cb   :  { %v2379_v23 = vpop.xlane.xlu1 %2378 }
 0x5cc   :  { %3377 = vrcp.f32 %v2379_v23 }
 0x5d0   :  { %v3372_v2 = vpop.eup %3371 }
 0x5d1   :  { %v2450_v13 = vmul.f32 %v3372_v2, %v4299_v35 }
 0x5d2   :  { %v3374_v11 = vpop.eup %3373 }
 0x5d3   :  { %2482 = vst [vmem:[%s4464_s9 + $0xd0] sm:$0xff] %v2450_v13  ;;  %v2451_v21 = vmul.f32 %v3374_v11, %v4302_v16 }
 0x5d4   :  { %v3376_v26 = vpop.eup %3375 }
 0x5d5   :  { %2483 = vst [vmem:[%s4464_s9 + $0xd8] sm:$0xff] %v2451_v21  ;;  %v2448_v12 = vmul.f32 %v3376_v26, %v4306_v37 }
 0x5d6   :  { %v3378_v31 = vpop.eup %3377  ;;  %v2385_v18 = vpop.xlane.xlu0 %2384 }
 0x5d7   :  { %2480 = vst [vmem:[%s4464_s9 + $0xc0] sm:$0xff] %v2448_v12  ;;  %v2449_v35 = vmul.f32 %v3378_v31, %v4310_v28  ;;  %3379 = vrcp.f32 %v2385_v18 }
 0x5d8   :  { %v2387_v34 = vpop.xlane.xlu1 %2386 }
 0x5d9   :  { %2481 = vst [vmem:[%s4464_s9 + $0xc8] sm:$0xff] %v2449_v35  ;;  %3381 = vrcp.f32 %v2387_v34 }
 0x5da   :  { %v2389_v16 = vpop.xlane.xlu0 %2388 }
 0x5db   :  { %3383 = vrcp.f32 %v2389_v16 }
 0x5dc   :  { %v2391_v25 = vpop.xlane.xlu1 %2390 }
 0x5dd   :  { %3385 = vrcp.f32 %v2391_v25 }
 0x5e1   :  { %v3380_v37 = vpop.eup %3379 }
 0x5e2   :  { %v2452_v58 = vmul.f32 %v3380_v37, %v4315_v44 }
 0x5e3   :  { %v3382_v40 = vpop.eup %3381 }
 0x5e4   :  { %2484 = vst [vmem:[%s4464_s9 + $0xe0] sm:$0xff] %v2452_v58  ;;  %v2453_v28 = vmul.f32 %v3382_v40, %v4318_v43 }
 0x5e5   :  { %v3384_v38 = vpop.eup %3383 }
 0x5e6   :  { %2485 = vst [vmem:[%s4464_s9 + $0xe8] sm:$0xff] %v2453_v28  ;;  %v2454_v14 = vmul.f32 %v3384_v38, %v4321_v20 }
 0x5e7   :  { %v3386_v61 = vpop.eup %3385 }
 0x5e8   :  { %2486 = vst [vmem:[%s4464_s9 + $0xf0] sm:$0xff] %v2454_v14  ;;  %v2455_v44 = vmul.f32 %v3386_v61, %v4324_v45 }
 0x5ea   :  { %2487 = vst [vmem:[%s4464_s9 + $0xf8] sm:$0xff] %v2455_v44 }

</bundles_post_ra>
